<compile_context>
chip_gen: v6e
topology: v6e:2x2x1
jax: 0.10.0
libtpu: 0.0.40
codegen_flags: <defaults>
</compile_context>

<pallas_src>
import functools

import jax
import jax.numpy as jnp
from jax.experimental import pallas as pl
from jax.experimental.pallas import tpu as pltpu

NEG_SLOPE = 0.2
BN_EPS = 1e-5
KSIZE = 4
PAD = 1

LANE = 128                       # C_out tile (lane width; also v5e-MXU friendly)
TM_MAX = 256                     # M (=N*H_out*W_out) tile
VMEM_LIMIT = 32 * 1024 * 1024    # scoped-VMEM budget with headroom on all gens


def _round_up(x, m):
    return (x + m - 1) // m * m


def _pick_tk(k_pad):
    for cand in (512, 256, 128):
        if k_pad % cand == 0:
            return cand
    return 128


# ---------------------------------------------------------------------------
# Pallas kernels
# ---------------------------------------------------------------------------
def _conv_kernel(*refs, with_bias, with_stats, neg_slope):
    """Tiled matmul conv: patches(TM,TK)bf16 x W(TK,TN)bf16 -> f32 + epilogue.

    Optional second output accumulates per-channel [sum; sum_sq] of the final
    activation tile (used to derive BatchNorm batch statistics without an
    extra reduction pass over the activation).
    """
    it = iter(refs)
    a_ref = next(it)                                   # (TM, TK) bf16
    w_ref = next(it)                                   # (TK, TN) bf16
    b_ref = next(it) if with_bias else None            # (1, TN) f32
    o_ref = next(it)                                   # (TM, TN) f32
    stats_ref = next(it) if with_stats else None       # (2, TN) f32
    acc_ref = next(it)                                 # (TM, TN) f32 scratch

    i = pl.program_id(1)
    k = pl.program_id(2)
    nk = pl.num_programs(2)

    @pl.when(k == 0)
    def _():
        acc_ref[...] = jnp.zeros_like(acc_ref)

    if with_stats:
        @pl.when((i == 0) & (k == 0))
        def _():
            stats_ref[...] = jnp.zeros_like(stats_ref)

    acc_ref[...] += jnp.dot(a_ref[...], w_ref[...],
                            preferred_element_type=jnp.float32)

    @pl.when(k == nk - 1)
    def _():
        y = acc_ref[...]
        if with_bias:
            y = y + b_ref[...]
        if neg_slope is not None:
            y = jnp.where(y >= 0.0, y, neg_slope * y)
        o_ref[...] = y
        if with_stats:
            stats_ref[...] = stats_ref[...] + jnp.concatenate(
                [jnp.sum(y, axis=0, keepdims=True),
                 jnp.sum(y * y, axis=0, keepdims=True)], axis=0)


def _bn_act_kernel(y_ref, scale_ref, shift_ref, o_ref, *, neg_slope):
    # Per-channel affine normalization (scale/shift precomputed from the batch
    # statistics gathered in the conv epilogue) fused with LeakyReLU.
    z = y_ref[...] * scale_ref[...] + shift_ref[...]
    o_ref[...] = jnp.where(z >= 0.0, z, neg_slope * z)


# ---------------------------------------------------------------------------
# Pallas wrappers
# ---------------------------------------------------------------------------
def conv_matmul_pallas(patches, w_mat, bias, *, tm, tk, act, with_stats):
    mp, kp = patches.shape
    kp2, cp = w_mat.shape
    assert kp == kp2 and mp % tm == 0 and kp % tk == 0 and cp % LANE == 0

    grid = (cp // LANE, mp // tm, kp // tk)            # (j, i, k): K innermost

    in_specs = [
        pl.BlockSpec((tm, tk), lambda j, i, k: (i, k)),
        pl.BlockSpec((tk, LANE), lambda j, i, k: (k, j)),
    ]
    args = [patches, w_mat]
    if bias is not None:
        in_specs.append(pl.BlockSpec((1, LANE), lambda j, i, k: (0, j)))
        args.append(bias)

    out_shape = [jax.ShapeDtypeStruct((mp, cp), jnp.float32)]
    out_specs = [pl.BlockSpec((tm, LANE), lambda j, i, k: (i, j))]
    if with_stats:
        out_shape.append(jax.ShapeDtypeStruct((2, cp), jnp.float32))
        out_specs.append(pl.BlockSpec((2, LANE), lambda j, i, k: (0, j)))

    kern = functools.partial(
        _conv_kernel, with_bias=bias is not None, with_stats=with_stats,
        neg_slope=NEG_SLOPE if act else None)

    # Stats accumulate over the M axis -> it must stay "arbitrary"; otherwise
    # M is independent and can be sharded across cores (v7x megacore).
    sem = (("parallel", "arbitrary", "arbitrary") if with_stats
           else ("parallel", "parallel", "arbitrary"))

    return pl.pallas_call(
        kern,
        out_shape=out_shape,
        grid=grid,
        in_specs=in_specs,
        out_specs=out_specs,
        scratch_shapes=[pltpu.VMEM((tm, LANE), jnp.float32)],
        compiler_params=pltpu.CompilerParams(
            dimension_semantics=sem, vmem_limit_bytes=VMEM_LIMIT),
    )(*args)


def bn_act_pallas(y, scale, shift, *, tm):
    mp, cp = y.shape
    grid = (mp // tm, cp // LANE)
    kern = functools.partial(_bn_act_kernel, neg_slope=NEG_SLOPE)
    return pl.pallas_call(
        kern,
        out_shape=jax.ShapeDtypeStruct((mp, cp), jnp.float32),
        grid=grid,
        in_specs=[
            pl.BlockSpec((tm, LANE), lambda i, j: (i, j)),
            pl.BlockSpec((1, LANE), lambda i, j: (0, j)),
            pl.BlockSpec((1, LANE), lambda i, j: (0, j)),
        ],
        out_specs=pl.BlockSpec((tm, LANE), lambda i, j: (i, j)),
        compiler_params=pltpu.CompilerParams(
            dimension_semantics=("parallel", "parallel"),
            vmem_limit_bytes=VMEM_LIMIT),
    )(y, scale, shift)


# ---------------------------------------------------------------------------
# Host-side glue: NHWC patch extraction (pure data movement)
# ---------------------------------------------------------------------------
def _im2col_nhwc(x, stride):
    # TODO(synk): replace host-side im2col with in-kernel tap accumulation
    # (16 shifted (TM,Cin)x(Cin,Cout) matmuls on an NHWC row band) to cut the
    # patch-operand HBM traffic for large inputs.
    n, h, w, c = x.shape
    xp = jnp.pad(x, ((0, 0), (PAD, PAD), (PAD, PAD), (0, 0)))
    h_out = (h + 2 * PAD - KSIZE) // stride + 1
    w_out = (w + 2 * PAD - KSIZE) // stride + 1
    cols = []
    for i in range(KSIZE):
        for j in range(KSIZE):
            cols.append(xp[:, i:i + stride * (h_out - 1) + 1:stride,
                           j:j + stride * (w_out - 1) + 1:stride, :])
    p = jnp.stack(cols, axis=3)                 # (N, h_out, w_out, kh*kw, C)
    p = p.reshape(n * h_out * w_out, KSIZE * KSIZE * c)
    return p, h_out, w_out


# ---------------------------------------------------------------------------
# Module: parameter init (prep hoisted here) + forward
# ---------------------------------------------------------------------------
def init_params(key, in_channels=3, dim=64, n_layers=3):
    cfgs = [dict(cin=in_channels, cout=dim, stride=2, bias=True, bn=False, act=True)]
    cur = dim
    for i in range(1, n_layers):
        o = dim * min(2 ** i, 8)
        cfgs.append(dict(cin=cur, cout=o, stride=2, bias=False, bn=True, act=True))
        cur = o
    o = dim * min(2 ** n_layers, 8)
    cfgs.append(dict(cin=cur, cout=o, stride=1, bias=False, bn=True, act=True))
    cfgs.append(dict(cin=o, cout=1, stride=1, bias=True, bn=False, act=False))

    params = []
    for cfg in cfgs:
        key, k1, k2 = jax.random.split(key, 3)
        cin, cout = cfg["cin"], cfg["cout"]
        fan_in = cin * KSIZE * KSIZE
        bound = 1.0 / (fan_in ** 0.5)          # Conv2d default init range
        w = jax.random.uniform(k1, (cout, cin, KSIZE, KSIZE), jnp.float32,
                               -bound, bound)

        k_real = cin * KSIZE * KSIZE
        k_pad = _round_up(k_real, LANE)
        c_pad = _round_up(cout, LANE)
        # (C_out,C_in,kh,kw) -> (kh,kw,C_in,C_out) -> (K,C_out): matches the
        # NHWC patch column order (kh*KSIZE + kw)*C_in + ci.  Zero-pad K and
        # C_out for lane-dense tiles; cast MXU operand to bf16 once here.
        w_mat = jnp.transpose(w, (2, 3, 1, 0)).reshape(k_real, cout)
        w_mat = jnp.pad(w_mat, ((0, k_pad - k_real), (0, c_pad - cout)))
        w_mat = w_mat.astype(jnp.bfloat16)

        if cfg["bias"]:
            b = jax.random.uniform(k2, (cout,), jnp.float32, -bound, bound)
            b = jnp.pad(b, (0, c_pad - cout)).reshape(1, c_pad)
        else:
            b = None                            # bias add skipped entirely

        params.append(dict(
            w_mat=w_mat, bias=b, stride=cfg["stride"], bn=cfg["bn"],
            act=cfg["act"], cout=cout, c_pad=c_pad,
            k_real=k_real, k_pad=k_pad, tk=_pick_tk(k_pad)))
    return params


def patchgan_forward(x_nchw, params):
    # NCHW -> NHWC once at the boundary; activations stay channels-last.
    x = jnp.transpose(x_nchw, (0, 2, 3, 1)).astype(jnp.float32)
    for p in params:
        n = x.shape[0]
        patches, h_out, w_out = _im2col_nhwc(x, p["stride"])
        m = patches.shape[0]
        tm = min(TM_MAX, _round_up(m, 8))
        m_pad = _round_up(m, tm)
        patches = jnp.pad(
            patches, ((0, m_pad - m), (0, p["k_pad"] - p["k_real"]))
        ).astype(jnp.bfloat16)

        fuse_act = p["act"] and not p["bn"]     # LeakyReLU fused into conv
        res = conv_matmul_pallas(
            patches, p["w_mat"], p["bias"],
            tm=tm, tk=p["tk"], act=fuse_act, with_stats=p["bn"])
        y = res[0]

        if p["bn"]:
            stats = res[1]                      # [sum; sum_sq] over real rows
            mean = stats[0] / m
            var = jnp.maximum(stats[1] / m - mean * mean, 0.0)  # biased var
            scale = jax.lax.rsqrt(var + BN_EPS)                 # gamma = 1
            shift = -mean * scale                               # beta = 0
            y = bn_act_pallas(y, scale.reshape(1, -1), shift.reshape(1, -1),
                              tm=tm)

        # Drop the M / lane padding and keep only real channels so the next
        # layer's K dimension is not inflated by the padding.
        x = y[:m, :p["cout"]].reshape(n, h_out, w_out, p["cout"])
    return jnp.transpose(x, (0, 3, 1, 2))       # back to NCHW at the boundary


if __name__ == "__main__":
    key = jax.random.PRNGKey(0)
    kx, kp = jax.random.split(key)
    # Small shapes consistent with the module: spatial must be >= 32 so the
    # two stride-1 4x4 convs stay valid. batch=2, in_channels=3, dim=16.
    x = jax.random.normal(kx, (2, 3, 32, 32), dtype=jnp.float32)
    params = init_params(kp, in_channels=3, dim=16, n_layers=3)

    fwd = jax.jit(lambda inp: patchgan_forward(inp, params))
    out = jax.block_until_ready(fwd(x))

    # 32 -> 16 -> 8 -> 4 -> (s1) 3 -> (s1) 2 spatial; final conv 1 channel.
    assert out.shape == (2, 1, 2, 2), out.shape
    assert out.dtype == jnp.float32
    assert bool(jnp.all(jnp.isfinite(out)))
    print("KERNEL_OK")
</pallas_src>

<mosaic_0001>
module attributes {stable_mosaic.version = 11 : i64} {
  func.func @_conv_kernel(%arg0: i32, %arg1: i32, %arg2: i32, %arg3: memref<256x128xbf16, #tpu.memory_space<vmem>>, %arg4: memref<128x128xbf16, #tpu.memory_space<vmem>>, %arg5: memref<1x128xf32, #tpu.memory_space<vmem>>, %arg6: memref<256x128xf32, #tpu.memory_space<vmem>>, %arg7: memref<256x128xf32, #tpu.memory_space<vmem>>) attributes {dimension_semantics = [#tpu.dimension_semantics<parallel>, #tpu.dimension_semantics<parallel>, #tpu.dimension_semantics<arbitrary>], iteration_bounds = array<i64: 1, 2, 1>, scalar_prefetch = 0 : i64, scratch_operands = 1 : i64, tpu.core_type = #tpu.core_type<tc>, window_params = [{transform_indices = @transform_0, window_bounds = array<i64: 256, 128>}, {transform_indices = @transform_1, window_bounds = array<i64: 128, 128>}, {transform_indices = @transform_2, window_bounds = array<i64: 1, 128>}, {transform_indices = @transform_3, window_bounds = array<i64: 256, 128>}]} {
    %c0_i32 = arith.constant 0 : i32
    %0 = arith.cmpi eq, %arg2, %c0_i32 : i32
    %1 = arith.extui %0 : i1 to i32
    %c0_i32_0 = arith.constant 0 : i32
    %2 = arith.cmpi ne, %1, %c0_i32_0 : i32
    scf.if %2 {
      %cst_10 = arith.constant 0.000000e+00 : f32
      %12 = vector.broadcast %cst_10 : f32 to vector<256x128xf32>
      %c0_11 = arith.constant 0 : index
      %c0_12 = arith.constant 0 : index
      %13 = vector.load %arg7[%c0_11, %c0_12] : memref<256x128xf32, #tpu.memory_space<vmem>>, vector<256x128xf32>
      tpu.vector_store %arg7[%c0_11, %c0_12], %12 {strides = array<i32>} : memref<256x128xf32, #tpu.memory_space<vmem>>, vector<256x128xf32>,
    } else {
    }
    %c0 = arith.constant 0 : index
    %c0_1 = arith.constant 0 : index
    %3 = vector.load %arg7[%c0, %c0_1] : memref<256x128xf32, #tpu.memory_space<vmem>>, vector<256x128xf32>
    %c0_2 = arith.constant 0 : index
    %c0_3 = arith.constant 0 : index
    %4 = vector.load %arg3[%c0_2, %c0_3] : memref<256x128xbf16, #tpu.memory_space<vmem>>, vector<256x128xbf16>
    %c0_4 = arith.constant 0 : index
    %c0_5 = arith.constant 0 : index
    %5 = vector.load %arg4[%c0_4, %c0_5] : memref<128x128xbf16, #tpu.memory_space<vmem>>, vector<128x128xbf16>
    %cst = arith.constant dense<0.000000e+00> : vector<256x128xf32>
    %6 = tpu.matmul %4, %5, %cst {dimension_numbers = #tpu.dot_dimension_numbers<[1], [0], [0], [1], [0, 0, 1, 1], [], []>} : vector<256x128xbf16>, vector<128x128xbf16>, vector<256x128xf32> -> vector<256x128xf32>
    %7 = arith.addf %3, %6 : vector<256x128xf32>
    %c0_6 = arith.constant 0 : index
    %c0_7 = arith.constant 0 : index
    %8 = vector.load %arg7[%c0_6, %c0_7] : memref<256x128xf32, #tpu.memory_space<vmem>>, vector<256x128xf32>
    tpu.vector_store %arg7[%c0_6, %c0_7], %7 {strides = array<i32>} : memref<256x128xf32, #tpu.memory_space<vmem>>, vector<256x128xf32>,
    %c0_i32_8 = arith.constant 0 : i32
    %9 = arith.cmpi eq, %arg2, %c0_i32_8 : i32
    %10 = arith.extui %9 : i1 to i32
    %c0_i32_9 = arith.constant 0 : i32
    %11 = arith.cmpi ne, %10, %c0_i32_9 : i32
    scf.if %11 {
      %c0_10 = arith.constant 0 : index
      %c0_11 = arith.constant 0 : index
      %12 = vector.load %arg7[%c0_10, %c0_11] : memref<256x128xf32, #tpu.memory_space<vmem>>, vector<256x128xf32>
      %c0_12 = arith.constant 0 : index
      %c0_13 = arith.constant 0 : index
      %13 = vector.load %arg5[%c0_12, %c0_13] : memref<1x128xf32, #tpu.memory_space<vmem>>, vector<1x128xf32>
      %14 = vector.broadcast %13 : vector<1x128xf32> to vector<256x128xf32>
      %15 = arith.addf %12, %14 : vector<256x128xf32>
      %cst_14 = arith.constant 0.000000e+00 : f32
      %16 = vector.broadcast %cst_14 : f32 to vector<256x128xf32>
      %17 = arith.cmpf oge, %15, %16 : vector<256x128xf32>
      %cst_15 = arith.constant 2.000000e-01 : f32
      %18 = vector.broadcast %cst_15 : f32 to vector<256x128xf32>
      %19 = arith.mulf %18, %15 : vector<256x128xf32>
      %20 = arith.select %17, %15, %19 : vector<256x128xi1>, vector<256x128xf32>
      %c0_16 = arith.constant 0 : index
      %c0_17 = arith.constant 0 : index
      %21 = vector.load %arg6[%c0_16, %c0_17] : memref<256x128xf32, #tpu.memory_space<vmem>>, vector<256x128xf32>
      tpu.vector_store %arg6[%c0_16, %c0_17], %20 {strides = array<i32>} : memref<256x128xf32, #tpu.memory_space<vmem>>, vector<256x128xf32>,
    } else {
    }
    return
  }
  func.func @transform_0(%arg0: i32, %arg1: i32, %arg2: i32) -> (i32, i32) {
    %c0_i32 = arith.constant 0 : i32
    return %arg1, %arg2 : i32, i32
  }
  func.func @transform_1(%arg0: i32, %arg1: i32, %arg2: i32) -> (i32, i32) {
    %c0_i32 = arith.constant 0 : i32
    return %arg2, %arg0 : i32, i32
  }
  func.func @transform_2(%arg0: i32, %arg1: i32, %arg2: i32) -> (i32, i32) {
    %c0_i32 = arith.constant 0 : i32
    %c0_i32_0 = arith.constant 0 : i32
    return %c0_i32, %arg0 : i32, i32
  }
  func.func @transform_3(%arg0: i32, %arg1: i32, %arg2: i32) -> (i32, i32) {
    %c0_i32 = arith.constant 0 : i32
    return %arg1, %arg0 : i32, i32
  }
}

module attributes {stable_mosaic.version = 11 : i64} {
  func.func @_conv_kernel(%arg0: i32, %arg1: i32, %arg2: i32, %arg3: memref<128x256xbf16, #tpu.memory_space<vmem>>, %arg4: memref<256x128xbf16, #tpu.memory_space<vmem>>, %arg5: memref<128x128xf32, #tpu.memory_space<vmem>>, %arg6: memref<2x128xf32, #tpu.memory_space<vmem>>, %arg7: memref<128x128xf32, #tpu.memory_space<vmem>>) attributes {dimension_semantics = [#tpu.dimension_semantics<parallel>, #tpu.dimension_semantics<arbitrary>, #tpu.dimension_semantics<arbitrary>], iteration_bounds = array<i64: 1, 1, 1>, scalar_prefetch = 0 : i64, scratch_operands = 1 : i64, tpu.core_type = #tpu.core_type<tc>, window_params = [{transform_indices = @transform_0, window_bounds = array<i64: 128, 256>}, {transform_indices = @transform_1, window_bounds = array<i64: 256, 128>}, {transform_indices = @transform_2, window_bounds = array<i64: 128, 128>}, {transform_indices = @transform_3, window_bounds = array<i64: 2, 128>}]} {
    %c0_i32 = arith.constant 0 : i32
    %0 = arith.cmpi eq, %arg2, %c0_i32 : i32
    %1 = arith.extui %0 : i1 to i32
    %c0_i32_0 = arith.constant 0 : i32
    %2 = arith.cmpi ne, %1, %c0_i32_0 : i32
    scf.if %2 {
      %cst_13 = arith.constant 0.000000e+00 : f32
      %17 = vector.broadcast %cst_13 : f32 to vector<128x128xf32>
      %c0_14 = arith.constant 0 : index
      %c0_15 = arith.constant 0 : index
      %18 = vector.load %arg7[%c0_14, %c0_15] : memref<128x128xf32, #tpu.memory_space<vmem>>, vector<128x128xf32>
      tpu.vector_store %arg7[%c0_14, %c0_15], %17 {strides = array<i32>} : memref<128x128xf32, #tpu.memory_space<vmem>>, vector<128x128xf32>,
    } else {
    }
    %c0_i32_1 = arith.constant 0 : i32
    %3 = arith.cmpi eq, %arg1, %c0_i32_1 : i32
    %c0_i32_2 = arith.constant 0 : i32
    %4 = arith.cmpi eq, %arg2, %c0_i32_2 : i32
    %5 = arith.andi %3, %4 : i1
    %6 = arith.extui %5 : i1 to i32
    %c0_i32_3 = arith.constant 0 : i32
    %7 = arith.cmpi ne, %6, %c0_i32_3 : i32
    scf.if %7 {
      %cst_13 = arith.constant 0.000000e+00 : f32
      %17 = vector.broadcast %cst_13 : f32 to vector<2x128xf32>
      %c0_14 = arith.constant 0 : index
      %c0_15 = arith.constant 0 : index
      %18 = vector.load %arg6[%c0_14, %c0_15] : memref<2x128xf32, #tpu.memory_space<vmem>>, vector<2x128xf32>
      tpu.vector_store %arg6[%c0_14, %c0_15], %17 {strides = array<i32>} : memref<2x128xf32, #tpu.memory_space<vmem>>, vector<2x128xf32>,
    } else {
    }
    %c0 = arith.constant 0 : index
    %c0_4 = arith.constant 0 : index
    %8 = vector.load %arg7[%c0, %c0_4] : memref<128x128xf32, #tpu.memory_space<vmem>>, vector<128x128xf32>
    %c0_5 = arith.constant 0 : index
    %c0_6 = arith.constant 0 : index
    %9 = vector.load %arg3[%c0_5, %c0_6] : memref<128x256xbf16, #tpu.memory_space<vmem>>, vector<128x256xbf16>
    %c0_7 = arith.constant 0 : index
    %c0_8 = arith.constant 0 : index
    %10 = vector.load %arg4[%c0_7, %c0_8] : memref<256x128xbf16, #tpu.memory_space<vmem>>, vector<256x128xbf16>
    %cst = arith.constant dense<0.000000e+00> : vector<128x128xf32>
    %11 = tpu.matmul %9, %10, %cst {dimension_numbers = #tpu.dot_dimension_numbers<[1], [0], [0], [1], [0, 0, 1, 1], [], []>} : vector<128x256xbf16>, vector<256x128xbf16>, vector<128x128xf32> -> vector<128x128xf32>
    %12 = arith.addf %8, %11 : vector<128x128xf32>
    %c0_9 = arith.constant 0 : index
    %c0_10 = arith.constant 0 : index
    %13 = vector.load %arg7[%c0_9, %c0_10] : memref<128x128xf32, #tpu.memory_space<vmem>>, vector<128x128xf32>
    tpu.vector_store %arg7[%c0_9, %c0_10], %12 {strides = array<i32>} : memref<128x128xf32, #tpu.memory_space<vmem>>, vector<128x128xf32>,
    %c0_i32_11 = arith.constant 0 : i32
    %14 = arith.cmpi eq, %arg2, %c0_i32_11 : i32
    %15 = arith.extui %14 : i1 to i32
    %c0_i32_12 = arith.constant 0 : i32
    %16 = arith.cmpi ne, %15, %c0_i32_12 : i32
    scf.if %16 {
      %c0_13 = arith.constant 0 : index
      %c0_14 = arith.constant 0 : index
      %17 = vector.load %arg7[%c0_13, %c0_14] : memref<128x128xf32, #tpu.memory_space<vmem>>, vector<128x128xf32>
      %c0_15 = arith.constant 0 : index
      %c0_16 = arith.constant 0 : index
      %18 = vector.load %arg5[%c0_15, %c0_16] : memref<128x128xf32, #tpu.memory_space<vmem>>, vector<128x128xf32>
      tpu.vector_store %arg5[%c0_15, %c0_16], %17 {strides = array<i32>} : memref<128x128xf32, #tpu.memory_space<vmem>>, vector<128x128xf32>,
      %c0_17 = arith.constant 0 : index
      %c0_18 = arith.constant 0 : index
      %19 = vector.load %arg6[%c0_17, %c0_18] : memref<2x128xf32, #tpu.memory_space<vmem>>, vector<2x128xf32>
      %cst_19 = arith.constant dense<0.000000e+00> : vector<128xf32>
      %20 = vector.multi_reduction <add>, %17, %cst_19 [0] : vector<128x128xf32> to vector<128xf32>
      %21 = vector.shape_cast %20 : vector<128xf32> to vector<1x128xf32>
      %22 = arith.mulf %17, %17 : vector<128x128xf32>
      %cst_20 = arith.constant dense<0.000000e+00> : vector<128xf32>
      %23 = vector.multi_reduction <add>, %22, %cst_20 [0] : vector<128x128xf32> to vector<128xf32>
      %24 = vector.shape_cast %23 : vector<128xf32> to vector<1x128xf32>
      %25 = tpu.concatenate %21, %24 in 0 : vector<1x128xf32>, vector<1x128xf32> -> vector<2x128xf32>
      %26 = arith.addf %19, %25 : vector<2x128xf32>
      %c0_21 = arith.constant 0 : index
      %c0_22 = arith.constant 0 : index
      %27 = vector.load %arg6[%c0_21, %c0_22] : memref<2x128xf32, #tpu.memory_space<vmem>>, vector<2x128xf32>
      tpu.vector_store %arg6[%c0_21, %c0_22], %26 {strides = array<i32>} : memref<2x128xf32, #tpu.memory_space<vmem>>, vector<2x128xf32>,
    } else {
    }
    return
  }
  func.func @transform_0(%arg0: i32, %arg1: i32, %arg2: i32) -> (i32, i32) {
    %c0_i32 = arith.constant 0 : i32
    return %arg1, %arg2 : i32, i32
  }
  func.func @transform_1(%arg0: i32, %arg1: i32, %arg2: i32) -> (i32, i32) {
    %c0_i32 = arith.constant 0 : i32
    return %arg2, %arg0 : i32, i32
  }
  func.func @transform_2(%arg0: i32, %arg1: i32, %arg2: i32) -> (i32, i32) {
    %c0_i32 = arith.constant 0 : i32
    return %arg1, %arg0 : i32, i32
  }
  func.func @transform_3(%arg0: i32, %arg1: i32, %arg2: i32) -> (i32, i32) {
    %c0_i32 = arith.constant 0 : i32
    %c0_i32_0 = arith.constant 0 : i32
    return %c0_i32, %arg0 : i32, i32
  }
}

module attributes {stable_mosaic.version = 11 : i64} {
  func.func @_bn_act_kernel(%arg0: i32, %arg1: i32, %arg2: memref<128x128xf32, #tpu.memory_space<vmem>>, %arg3: memref<1x128xf32, #tpu.memory_space<vmem>>, %arg4: memref<1x128xf32, #tpu.memory_space<vmem>>, %arg5: memref<128x128xf32, #tpu.memory_space<vmem>>) attributes {dimension_semantics = [#tpu.dimension_semantics<parallel>, #tpu.dimension_semantics<parallel>], iteration_bounds = array<i64: 1, 1>, scalar_prefetch = 0 : i64, scratch_operands = 0 : i64, tpu.core_type = #tpu.core_type<tc>, window_params = [{transform_indices = @transform_0, window_bounds = array<i64: 128, 128>}, {transform_indices = @transform_1, window_bounds = array<i64: 1, 128>}, {transform_indices = @transform_2, window_bounds = array<i64: 1, 128>}, {transform_indices = @transform_3, window_bounds = array<i64: 128, 128>}]} {
    %c0 = arith.constant 0 : index
    %c0_0 = arith.constant 0 : index
    %0 = vector.load %arg2[%c0, %c0_0] : memref<128x128xf32, #tpu.memory_space<vmem>>, vector<128x128xf32>
    %c0_1 = arith.constant 0 : index
    %c0_2 = arith.constant 0 : index
    %1 = vector.load %arg3[%c0_1, %c0_2] : memref<1x128xf32, #tpu.memory_space<vmem>>, vector<1x128xf32>
    %2 = vector.broadcast %1 : vector<1x128xf32> to vector<128x128xf32>
    %3 = arith.mulf %0, %2 : vector<128x128xf32>
    %c0_3 = arith.constant 0 : index
    %c0_4 = arith.constant 0 : index
    %4 = vector.load %arg4[%c0_3, %c0_4] : memref<1x128xf32, #tpu.memory_space<vmem>>, vector<1x128xf32>
    %5 = vector.broadcast %4 : vector<1x128xf32> to vector<128x128xf32>
    %6 = arith.addf %3, %5 : vector<128x128xf32>
    %cst = arith.constant 0.000000e+00 : f32
    %7 = vector.broadcast %cst : f32 to vector<128x128xf32>
    %8 = arith.cmpf oge, %6, %7 : vector<128x128xf32>
    %cst_5 = arith.constant 2.000000e-01 : f32
    %9 = vector.broadcast %cst_5 : f32 to vector<128x128xf32>
    %10 = arith.mulf %9, %6 : vector<128x128xf32>
    %11 = arith.select %8, %6, %10 : vector<128x128xi1>, vector<128x128xf32>
    %c0_6 = arith.constant 0 : index
    %c0_7 = arith.constant 0 : index
    %12 = vector.load %arg5[%c0_6, %c0_7] : memref<128x128xf32, #tpu.memory_space<vmem>>, vector<128x128xf32>
    tpu.vector_store %arg5[%c0_6, %c0_7], %11 {strides = array<i32>} : memref<128x128xf32, #tpu.memory_space<vmem>>, vector<128x128xf32>,
    return
  }
  func.func @transform_0(%arg0: i32, %arg1: i32) -> (i32, i32) {
    %c0_i32 = arith.constant 0 : i32
    return %arg0, %arg1 : i32, i32
  }
  func.func @transform_1(%arg0: i32, %arg1: i32) -> (i32, i32) {
    %c0_i32 = arith.constant 0 : i32
    %c0_i32_0 = arith.constant 0 : i32
    return %c0_i32, %arg1 : i32, i32
  }
  func.func @transform_2(%arg0: i32, %arg1: i32) -> (i32, i32) {
    %c0_i32 = arith.constant 0 : i32
    %c0_i32_0 = arith.constant 0 : i32
    return %c0_i32, %arg1 : i32, i32
  }
  func.func @transform_3(%arg0: i32, %arg1: i32) -> (i32, i32) {
    %c0_i32 = arith.constant 0 : i32
    return %arg0, %arg1 : i32, i32
  }
}

module attributes {stable_mosaic.version = 11 : i64} {
  func.func @_conv_kernel(%arg0: i32, %arg1: i32, %arg2: i32, %arg3: memref<32x512xbf16, #tpu.memory_space<vmem>>, %arg4: memref<512x128xbf16, #tpu.memory_space<vmem>>, %arg5: memref<32x128xf32, #tpu.memory_space<vmem>>, %arg6: memref<2x128xf32, #tpu.memory_space<vmem>>, %arg7: memref<32x128xf32, #tpu.memory_space<vmem>>) attributes {dimension_semantics = [#tpu.dimension_semantics<parallel>, #tpu.dimension_semantics<arbitrary>, #tpu.dimension_semantics<arbitrary>], iteration_bounds = array<i64: 1, 1, 1>, scalar_prefetch = 0 : i64, scratch_operands = 1 : i64, tpu.core_type = #tpu.core_type<tc>, window_params = [{transform_indices = @transform_0, window_bounds = array<i64: 32, 512>}, {transform_indices = @transform_1, window_bounds = array<i64: 512, 128>}, {transform_indices = @transform_2, window_bounds = array<i64: 32, 128>}, {transform_indices = @transform_3, window_bounds = array<i64: 2, 128>}]} {
    %c0_i32 = arith.constant 0 : i32
    %0 = arith.cmpi eq, %arg2, %c0_i32 : i32
    %1 = arith.extui %0 : i1 to i32
    %c0_i32_0 = arith.constant 0 : i32
    %2 = arith.cmpi ne, %1, %c0_i32_0 : i32
    scf.if %2 {
      %cst_13 = arith.constant 0.000000e+00 : f32
      %17 = vector.broadcast %cst_13 : f32 to vector<32x128xf32>
      %c0_14 = arith.constant 0 : index
      %c0_15 = arith.constant 0 : index
      %18 = vector.load %arg7[%c0_14, %c0_15] : memref<32x128xf32, #tpu.memory_space<vmem>>, vector<32x128xf32>
      tpu.vector_store %arg7[%c0_14, %c0_15], %17 {strides = array<i32>} : memref<32x128xf32, #tpu.memory_space<vmem>>, vector<32x128xf32>,
    } else {
    }
    %c0_i32_1 = arith.constant 0 : i32
    %3 = arith.cmpi eq, %arg1, %c0_i32_1 : i32
    %c0_i32_2 = arith.constant 0 : i32
    %4 = arith.cmpi eq, %arg2, %c0_i32_2 : i32
    %5 = arith.andi %3, %4 : i1
    %6 = arith.extui %5 : i1 to i32
    %c0_i32_3 = arith.constant 0 : i32
    %7 = arith.cmpi ne, %6, %c0_i32_3 : i32
    scf.if %7 {
      %cst_13 = arith.constant 0.000000e+00 : f32
      %17 = vector.broadcast %cst_13 : f32 to vector<2x128xf32>
      %c0_14 = arith.constant 0 : index
      %c0_15 = arith.constant 0 : index
      %18 = vector.load %arg6[%c0_14, %c0_15] : memref<2x128xf32, #tpu.memory_space<vmem>>, vector<2x128xf32>
      tpu.vector_store %arg6[%c0_14, %c0_15], %17 {strides = array<i32>} : memref<2x128xf32, #tpu.memory_space<vmem>>, vector<2x128xf32>,
    } else {
    }
    %c0 = arith.constant 0 : index
    %c0_4 = arith.constant 0 : index
    %8 = vector.load %arg7[%c0, %c0_4] : memref<32x128xf32, #tpu.memory_space<vmem>>, vector<32x128xf32>
    %c0_5 = arith.constant 0 : index
    %c0_6 = arith.constant 0 : index
    %9 = vector.load %arg3[%c0_5, %c0_6] : memref<32x512xbf16, #tpu.memory_space<vmem>>, vector<32x512xbf16>
    %c0_7 = arith.constant 0 : index
    %c0_8 = arith.constant 0 : index
    %10 = vector.load %arg4[%c0_7, %c0_8] : memref<512x128xbf16, #tpu.memory_space<vmem>>, vector<512x128xbf16>
    %cst = arith.constant dense<0.000000e+00> : vector<32x128xf32>
    %11 = tpu.matmul %9, %10, %cst {dimension_numbers = #tpu.dot_dimension_numbers<[1], [0], [0], [1], [0, 0, 1, 1], [], []>} : vector<32x512xbf16>, vector<512x128xbf16>, vector<32x128xf32> -> vector<32x128xf32>
    %12 = arith.addf %8, %11 : vector<32x128xf32>
    %c0_9 = arith.constant 0 : index
    %c0_10 = arith.constant 0 : index
    %13 = vector.load %arg7[%c0_9, %c0_10] : memref<32x128xf32, #tpu.memory_space<vmem>>, vector<32x128xf32>
    tpu.vector_store %arg7[%c0_9, %c0_10], %12 {strides = array<i32>} : memref<32x128xf32, #tpu.memory_space<vmem>>, vector<32x128xf32>,
    %c0_i32_11 = arith.constant 0 : i32
    %14 = arith.cmpi eq, %arg2, %c0_i32_11 : i32
    %15 = arith.extui %14 : i1 to i32
    %c0_i32_12 = arith.constant 0 : i32
    %16 = arith.cmpi ne, %15, %c0_i32_12 : i32
    scf.if %16 {
      %c0_13 = arith.constant 0 : index
      %c0_14 = arith.constant 0 : index
      %17 = vector.load %arg7[%c0_13, %c0_14] : memref<32x128xf32, #tpu.memory_space<vmem>>, vector<32x128xf32>
      %c0_15 = arith.constant 0 : index
      %c0_16 = arith.constant 0 : index
      %18 = vector.load %arg5[%c0_15, %c0_16] : memref<32x128xf32, #tpu.memory_space<vmem>>, vector<32x128xf32>
      tpu.vector_store %arg5[%c0_15, %c0_16], %17 {strides = array<i32>} : memref<32x128xf32, #tpu.memory_space<vmem>>, vector<32x128xf32>,
      %c0_17 = arith.constant 0 : index
      %c0_18 = arith.constant 0 : index
      %19 = vector.load %arg6[%c0_17, %c0_18] : memref<2x128xf32, #tpu.memory_space<vmem>>, vector<2x128xf32>
      %cst_19 = arith.constant dense<0.000000e+00> : vector<128xf32>
      %20 = vector.multi_reduction <add>, %17, %cst_19 [0] : vector<32x128xf32> to vector<128xf32>
      %21 = vector.shape_cast %20 : vector<128xf32> to vector<1x128xf32>
      %22 = arith.mulf %17, %17 : vector<32x128xf32>
      %cst_20 = arith.constant dense<0.000000e+00> : vector<128xf32>
      %23 = vector.multi_reduction <add>, %22, %cst_20 [0] : vector<32x128xf32> to vector<128xf32>
      %24 = vector.shape_cast %23 : vector<128xf32> to vector<1x128xf32>
      %25 = tpu.concatenate %21, %24 in 0 : vector<1x128xf32>, vector<1x128xf32> -> vector<2x128xf32>
      %26 = arith.addf %19, %25 : vector<2x128xf32>
      %c0_21 = arith.constant 0 : index
      %c0_22 = arith.constant 0 : index
      %27 = vector.load %arg6[%c0_21, %c0_22] : memref<2x128xf32, #tpu.memory_space<vmem>>, vector<2x128xf32>
      tpu.vector_store %arg6[%c0_21, %c0_22], %26 {strides = array<i32>} : memref<2x128xf32, #tpu.memory_space<vmem>>, vector<2x128xf32>,
    } else {
    }
    return
  }
  func.func @transform_0(%arg0: i32, %arg1: i32, %arg2: i32) -> (i32, i32) {
    %c0_i32 = arith.constant 0 : i32
    return %arg1, %arg2 : i32, i32
  }
  func.func @transform_1(%arg0: i32, %arg1: i32, %arg2: i32) -> (i32, i32) {
    %c0_i32 = arith.constant 0 : i32
    return %arg2, %arg0 : i32, i32
  }
  func.func @transform_2(%arg0: i32, %arg1: i32, %arg2: i32) -> (i32, i32) {
    %c0_i32 = arith.constant 0 : i32
    return %arg1, %arg0 : i32, i32
  }
  func.func @transform_3(%arg0: i32, %arg1: i32, %arg2: i32) -> (i32, i32) {
    %c0_i32 = arith.constant 0 : i32
    %c0_i32_0 = arith.constant 0 : i32
    return %c0_i32, %arg0 : i32, i32
  }
}

module attributes {stable_mosaic.version = 11 : i64} {
  func.func @_bn_act_kernel(%arg0: i32, %arg1: i32, %arg2: memref<32x128xf32, #tpu.memory_space<vmem>>, %arg3: memref<1x128xf32, #tpu.memory_space<vmem>>, %arg4: memref<1x128xf32, #tpu.memory_space<vmem>>, %arg5: memref<32x128xf32, #tpu.memory_space<vmem>>) attributes {dimension_semantics = [#tpu.dimension_semantics<parallel>, #tpu.dimension_semantics<parallel>], iteration_bounds = array<i64: 1, 1>, scalar_prefetch = 0 : i64, scratch_operands = 0 : i64, tpu.core_type = #tpu.core_type<tc>, window_params = [{transform_indices = @transform_0, window_bounds = array<i64: 32, 128>}, {transform_indices = @transform_1, window_bounds = array<i64: 1, 128>}, {transform_indices = @transform_2, window_bounds = array<i64: 1, 128>}, {transform_indices = @transform_3, window_bounds = array<i64: 32, 128>}]} {
    %c0 = arith.constant 0 : index
    %c0_0 = arith.constant 0 : index
    %0 = vector.load %arg2[%c0, %c0_0] : memref<32x128xf32, #tpu.memory_space<vmem>>, vector<32x128xf32>
    %c0_1 = arith.constant 0 : index
    %c0_2 = arith.constant 0 : index
    %1 = vector.load %arg3[%c0_1, %c0_2] : memref<1x128xf32, #tpu.memory_space<vmem>>, vector<1x128xf32>
    %2 = vector.broadcast %1 : vector<1x128xf32> to vector<32x128xf32>
    %3 = arith.mulf %0, %2 : vector<32x128xf32>
    %c0_3 = arith.constant 0 : index
    %c0_4 = arith.constant 0 : index
    %4 = vector.load %arg4[%c0_3, %c0_4] : memref<1x128xf32, #tpu.memory_space<vmem>>, vector<1x128xf32>
    %5 = vector.broadcast %4 : vector<1x128xf32> to vector<32x128xf32>
    %6 = arith.addf %3, %5 : vector<32x128xf32>
    %cst = arith.constant 0.000000e+00 : f32
    %7 = vector.broadcast %cst : f32 to vector<32x128xf32>
    %8 = arith.cmpf oge, %6, %7 : vector<32x128xf32>
    %cst_5 = arith.constant 2.000000e-01 : f32
    %9 = vector.broadcast %cst_5 : f32 to vector<32x128xf32>
    %10 = arith.mulf %9, %6 : vector<32x128xf32>
    %11 = arith.select %8, %6, %10 : vector<32x128xi1>, vector<32x128xf32>
    %c0_6 = arith.constant 0 : index
    %c0_7 = arith.constant 0 : index
    %12 = vector.load %arg5[%c0_6, %c0_7] : memref<32x128xf32, #tpu.memory_space<vmem>>, vector<32x128xf32>
    tpu.vector_store %arg5[%c0_6, %c0_7], %11 {strides = array<i32>} : memref<32x128xf32, #tpu.memory_space<vmem>>, vector<32x128xf32>,
    return
  }
  func.func @transform_0(%arg0: i32, %arg1: i32) -> (i32, i32) {
    %c0_i32 = arith.constant 0 : i32
    return %arg0, %arg1 : i32, i32
  }
  func.func @transform_1(%arg0: i32, %arg1: i32) -> (i32, i32) {
    %c0_i32 = arith.constant 0 : i32
    %c0_i32_0 = arith.constant 0 : i32
    return %c0_i32, %arg1 : i32, i32
  }
  func.func @transform_2(%arg0: i32, %arg1: i32) -> (i32, i32) {
    %c0_i32 = arith.constant 0 : i32
    %c0_i32_0 = arith.constant 0 : i32
    return %c0_i32, %arg1 : i32, i32
  }
  func.func @transform_3(%arg0: i32, %arg1: i32) -> (i32, i32) {
    %c0_i32 = arith.constant 0 : i32
    return %arg0, %arg1 : i32, i32
  }
}

module attributes {stable_mosaic.version = 11 : i64} {
  func.func @_bn_act_kernel(%arg0: i32, %arg1: i32, %arg2: memref<24x128xf32, #tpu.memory_space<vmem>>, %arg3: memref<1x128xf32, #tpu.memory_space<vmem>>, %arg4: memref<1x128xf32, #tpu.memory_space<vmem>>, %arg5: memref<24x128xf32, #tpu.memory_space<vmem>>) attributes {dimension_semantics = [#tpu.dimension_semantics<parallel>, #tpu.dimension_semantics<parallel>], iteration_bounds = array<i64: 1, 1>, scalar_prefetch = 0 : i64, scratch_operands = 0 : i64, tpu.core_type = #tpu.core_type<tc>, window_params = [{transform_indices = @transform_0, window_bounds = array<i64: 24, 128>}, {transform_indices = @transform_1, window_bounds = array<i64: 1, 128>}, {transform_indices = @transform_2, window_bounds = array<i64: 1, 128>}, {transform_indices = @transform_3, window_bounds = array<i64: 24, 128>}]} {
    %c0 = arith.constant 0 : index
    %c0_0 = arith.constant 0 : index
    %0 = vector.load %arg2[%c0, %c0_0] : memref<24x128xf32, #tpu.memory_space<vmem>>, vector<24x128xf32>
    %c0_1 = arith.constant 0 : index
    %c0_2 = arith.constant 0 : index
    %1 = vector.load %arg3[%c0_1, %c0_2] : memref<1x128xf32, #tpu.memory_space<vmem>>, vector<1x128xf32>
    %2 = vector.broadcast %1 : vector<1x128xf32> to vector<24x128xf32>
    %3 = arith.mulf %0, %2 : vector<24x128xf32>
    %c0_3 = arith.constant 0 : index
    %c0_4 = arith.constant 0 : index
    %4 = vector.load %arg4[%c0_3, %c0_4] : memref<1x128xf32, #tpu.memory_space<vmem>>, vector<1x128xf32>
    %5 = vector.broadcast %4 : vector<1x128xf32> to vector<24x128xf32>
    %6 = arith.addf %3, %5 : vector<24x128xf32>
    %cst = arith.constant 0.000000e+00 : f32
    %7 = vector.broadcast %cst : f32 to vector<24x128xf32>
    %8 = arith.cmpf oge, %6, %7 : vector<24x128xf32>
    %cst_5 = arith.constant 2.000000e-01 : f32
    %9 = vector.broadcast %cst_5 : f32 to vector<24x128xf32>
    %10 = arith.mulf %9, %6 : vector<24x128xf32>
    %11 = arith.select %8, %6, %10 : vector<24x128xi1>, vector<24x128xf32>
    %c0_6 = arith.constant 0 : index
    %c0_7 = arith.constant 0 : index
    %12 = vector.load %arg5[%c0_6, %c0_7] : memref<24x128xf32, #tpu.memory_space<vmem>>, vector<24x128xf32>
    tpu.vector_store %arg5[%c0_6, %c0_7], %11 {strides = array<i32>} : memref<24x128xf32, #tpu.memory_space<vmem>>, vector<24x128xf32>,
    return
  }
  func.func @transform_0(%arg0: i32, %arg1: i32) -> (i32, i32) {
    %c0_i32 = arith.constant 0 : i32
    return %arg0, %arg1 : i32, i32
  }
  func.func @transform_1(%arg0: i32, %arg1: i32) -> (i32, i32) {
    %c0_i32 = arith.constant 0 : i32
    %c0_i32_0 = arith.constant 0 : i32
    return %c0_i32, %arg1 : i32, i32
  }
  func.func @transform_2(%arg0: i32, %arg1: i32) -> (i32, i32) {
    %c0_i32 = arith.constant 0 : i32
    %c0_i32_0 = arith.constant 0 : i32
    return %c0_i32, %arg1 : i32, i32
  }
  func.func @transform_3(%arg0: i32, %arg1: i32) -> (i32, i32) {
    %c0_i32 = arith.constant 0 : i32
    return %arg0, %arg1 : i32, i32
  }
}

module attributes {stable_mosaic.version = 11 : i64} {
  func.func @_conv_kernel(%arg0: i32, %arg1: i32, %arg2: i32, %arg3: memref<24x512xbf16, #tpu.memory_space<vmem>>, %arg4: memref<512x128xbf16, #tpu.memory_space<vmem>>, %arg5: memref<24x128xf32, #tpu.memory_space<vmem>>, %arg6: memref<2x128xf32, #tpu.memory_space<vmem>>, %arg7: memref<24x128xf32, #tpu.memory_space<vmem>>) attributes {dimension_semantics = [#tpu.dimension_semantics<parallel>, #tpu.dimension_semantics<arbitrary>, #tpu.dimension_semantics<arbitrary>], iteration_bounds = array<i64: 1, 1, 2>, scalar_prefetch = 0 : i64, scratch_operands = 1 : i64, tpu.core_type = #tpu.core_type<tc>, window_params = [{transform_indices = @transform_0, window_bounds = array<i64: 24, 512>}, {transform_indices = @transform_1, window_bounds = array<i64: 512, 128>}, {transform_indices = @transform_2, window_bounds = array<i64: 24, 128>}, {transform_indices = @transform_3, window_bounds = array<i64: 2, 128>}]} {
    %c0_i32 = arith.constant 0 : i32
    %0 = arith.cmpi eq, %arg2, %c0_i32 : i32
    %1 = arith.extui %0 : i1 to i32
    %c0_i32_0 = arith.constant 0 : i32
    %2 = arith.cmpi ne, %1, %c0_i32_0 : i32
    scf.if %2 {
      %cst_12 = arith.constant 0.000000e+00 : f32
      %17 = vector.broadcast %cst_12 : f32 to vector<24x128xf32>
      %c0_13 = arith.constant 0 : index
      %c0_14 = arith.constant 0 : index
      %18 = vector.load %arg7[%c0_13, %c0_14] : memref<24x128xf32, #tpu.memory_space<vmem>>, vector<24x128xf32>
      tpu.vector_store %arg7[%c0_13, %c0_14], %17 {strides = array<i32>} : memref<24x128xf32, #tpu.memory_space<vmem>>, vector<24x128xf32>,
    } else {
    }
    %c0_i32_1 = arith.constant 0 : i32
    %3 = arith.cmpi eq, %arg1, %c0_i32_1 : i32
    %c0_i32_2 = arith.constant 0 : i32
    %4 = arith.cmpi eq, %arg2, %c0_i32_2 : i32
    %5 = arith.andi %3, %4 : i1
    %6 = arith.extui %5 : i1 to i32
    %c0_i32_3 = arith.constant 0 : i32
    %7 = arith.cmpi ne, %6, %c0_i32_3 : i32
    scf.if %7 {
      %cst_12 = arith.constant 0.000000e+00 : f32
      %17 = vector.broadcast %cst_12 : f32 to vector<2x128xf32>
      %c0_13 = arith.constant 0 : index
      %c0_14 = arith.constant 0 : index
      %18 = vector.load %arg6[%c0_13, %c0_14] : memref<2x128xf32, #tpu.memory_space<vmem>>, vector<2x128xf32>
      tpu.vector_store %arg6[%c0_13, %c0_14], %17 {strides = array<i32>} : memref<2x128xf32, #tpu.memory_space<vmem>>, vector<2x128xf32>,
    } else {
    }
    %c0 = arith.constant 0 : index
    %c0_4 = arith.constant 0 : index
    %8 = vector.load %arg7[%c0, %c0_4] : memref<24x128xf32, #tpu.memory_space<vmem>>, vector<24x128xf32>
    %c0_5 = arith.constant 0 : index
    %c0_6 = arith.constant 0 : index
    %9 = vector.load %arg3[%c0_5, %c0_6] : memref<24x512xbf16, #tpu.memory_space<vmem>>, vector<24x512xbf16>
    %c0_7 = arith.constant 0 : index
    %c0_8 = arith.constant 0 : index
    %10 = vector.load %arg4[%c0_7, %c0_8] : memref<512x128xbf16, #tpu.memory_space<vmem>>, vector<512x128xbf16>
    %cst = arith.constant dense<0.000000e+00> : vector<24x128xf32>
    %11 = tpu.matmul %9, %10, %cst {dimension_numbers = #tpu.dot_dimension_numbers<[1], [0], [0], [1], [0, 0, 1, 1], [], []>} : vector<24x512xbf16>, vector<512x128xbf16>, vector<24x128xf32> -> vector<24x128xf32>
    %12 = arith.addf %8, %11 : vector<24x128xf32>
    %c0_9 = arith.constant 0 : index
    %c0_10 = arith.constant 0 : index
    %13 = vector.load %arg7[%c0_9, %c0_10] : memref<24x128xf32, #tpu.memory_space<vmem>>, vector<24x128xf32>
    tpu.vector_store %arg7[%c0_9, %c0_10], %12 {strides = array<i32>} : memref<24x128xf32, #tpu.memory_space<vmem>>, vector<24x128xf32>,
    %c1_i32 = arith.constant 1 : i32
    %14 = arith.cmpi eq, %arg2, %c1_i32 : i32
    %15 = arith.extui %14 : i1 to i32
    %c0_i32_11 = arith.constant 0 : i32
    %16 = arith.cmpi ne, %15, %c0_i32_11 : i32
    scf.if %16 {
      %c0_12 = arith.constant 0 : index
      %c0_13 = arith.constant 0 : index
      %17 = vector.load %arg7[%c0_12, %c0_13] : memref<24x128xf32, #tpu.memory_space<vmem>>, vector<24x128xf32>
      %c0_14 = arith.constant 0 : index
      %c0_15 = arith.constant 0 : index
      %18 = vector.load %arg5[%c0_14, %c0_15] : memref<24x128xf32, #tpu.memory_space<vmem>>, vector<24x128xf32>
      tpu.vector_store %arg5[%c0_14, %c0_15], %17 {strides = array<i32>} : memref<24x128xf32, #tpu.memory_space<vmem>>, vector<24x128xf32>,
      %c0_16 = arith.constant 0 : index
      %c0_17 = arith.constant 0 : index
      %19 = vector.load %arg6[%c0_16, %c0_17] : memref<2x128xf32, #tpu.memory_space<vmem>>, vector<2x128xf32>
      %cst_18 = arith.constant dense<0.000000e+00> : vector<128xf32>
      %20 = vector.multi_reduction <add>, %17, %cst_18 [0] : vector<24x128xf32> to vector<128xf32>
      %21 = vector.shape_cast %20 : vector<128xf32> to vector<1x128xf32>
      %22 = arith.mulf %17, %17 : vector<24x128xf32>
      %cst_19 = arith.constant dense<0.000000e+00> : vector<128xf32>
      %23 = vector.multi_reduction <add>, %22, %cst_19 [0] : vector<24x128xf32> to vector<128xf32>
      %24 = vector.shape_cast %23 : vector<128xf32> to vector<1x128xf32>
      %25 = tpu.concatenate %21, %24 in 0 : vector<1x128xf32>, vector<1x128xf32> -> vector<2x128xf32>
      %26 = arith.addf %19, %25 : vector<2x128xf32>
      %c0_20 = arith.constant 0 : index
      %c0_21 = arith.constant 0 : index
      %27 = vector.load %arg6[%c0_20, %c0_21] : memref<2x128xf32, #tpu.memory_space<vmem>>, vector<2x128xf32>
      tpu.vector_store %arg6[%c0_20, %c0_21], %26 {strides = array<i32>} : memref<2x128xf32, #tpu.memory_space<vmem>>, vector<2x128xf32>,
    } else {
    }
    return
  }
  func.func @transform_0(%arg0: i32, %arg1: i32, %arg2: i32) -> (i32, i32) {
    %c0_i32 = arith.constant 0 : i32
    return %arg1, %arg2 : i32, i32
  }
  func.func @transform_1(%arg0: i32, %arg1: i32, %arg2: i32) -> (i32, i32) {
    %c0_i32 = arith.constant 0 : i32
    return %arg2, %arg0 : i32, i32
  }
  func.func @transform_2(%arg0: i32, %arg1: i32, %arg2: i32) -> (i32, i32) {
    %c0_i32 = arith.constant 0 : i32
    return %arg1, %arg0 : i32, i32
  }
  func.func @transform_3(%arg0: i32, %arg1: i32, %arg2: i32) -> (i32, i32) {
    %c0_i32 = arith.constant 0 : i32
    %c0_i32_0 = arith.constant 0 : i32
    return %c0_i32, %arg0 : i32, i32
  }
}

module attributes {stable_mosaic.version = 11 : i64} {
  func.func @_conv_kernel(%arg0: i32, %arg1: i32, %arg2: i32, %arg3: memref<8x512xbf16, #tpu.memory_space<vmem>>, %arg4: memref<512x128xbf16, #tpu.memory_space<vmem>>, %arg5: memref<1x128xf32, #tpu.memory_space<vmem>>, %arg6: memref<8x128xf32, #tpu.memory_space<vmem>>, %arg7: memref<8x128xf32, #tpu.memory_space<vmem>>) attributes {dimension_semantics = [#tpu.dimension_semantics<parallel>, #tpu.dimension_semantics<parallel>, #tpu.dimension_semantics<arbitrary>], iteration_bounds = array<i64: 1, 1, 4>, scalar_prefetch = 0 : i64, scratch_operands = 1 : i64, tpu.core_type = #tpu.core_type<tc>, window_params = [{transform_indices = @transform_0, window_bounds = array<i64: 8, 512>}, {transform_indices = @transform_1, window_bounds = array<i64: 512, 128>}, {transform_indices = @transform_2, window_bounds = array<i64: 1, 128>}, {transform_indices = @transform_3, window_bounds = array<i64: 8, 128>}]} {
    %c0_i32 = arith.constant 0 : i32
    %0 = arith.cmpi eq, %arg2, %c0_i32 : i32
    %1 = arith.extui %0 : i1 to i32
    %c0_i32_0 = arith.constant 0 : i32
    %2 = arith.cmpi ne, %1, %c0_i32_0 : i32
    scf.if %2 {
      %cst_9 = arith.constant 0.000000e+00 : f32
      %12 = vector.broadcast %cst_9 : f32 to vector<8x128xf32>
      %c0_10 = arith.constant 0 : index
      %c0_11 = arith.constant 0 : index
      %13 = vector.load %arg7[%c0_10, %c0_11] : memref<8x128xf32, #tpu.memory_space<vmem>>, vector<8x128xf32>
      tpu.vector_store %arg7[%c0_10, %c0_11], %12 {strides = array<i32>} : memref<8x128xf32, #tpu.memory_space<vmem>>, vector<8x128xf32>,
    } else {
    }
    %c0 = arith.constant 0 : index
    %c0_1 = arith.constant 0 : index
    %3 = vector.load %arg7[%c0, %c0_1] : memref<8x128xf32, #tpu.memory_space<vmem>>, vector<8x128xf32>
    %c0_2 = arith.constant 0 : index
    %c0_3 = arith.constant 0 : index
    %4 = vector.load %arg3[%c0_2, %c0_3] : memref<8x512xbf16, #tpu.memory_space<vmem>>, vector<8x512xbf16>
    %c0_4 = arith.constant 0 : index
    %c0_5 = arith.constant 0 : index
    %5 = vector.load %arg4[%c0_4, %c0_5] : memref<512x128xbf16, #tpu.memory_space<vmem>>, vector<512x128xbf16>
    %cst = arith.constant dense<0.000000e+00> : vector<8x128xf32>
    %6 = tpu.matmul %4, %5, %cst {dimension_numbers = #tpu.dot_dimension_numbers<[1], [0], [0], [1], [0, 0, 1, 1], [], []>} : vector<8x512xbf16>, vector<512x128xbf16>, vector<8x128xf32> -> vector<8x128xf32>
    %7 = arith.addf %3, %6 : vector<8x128xf32>
    %c0_6 = arith.constant 0 : index
    %c0_7 = arith.constant 0 : index
    %8 = vector.load %arg7[%c0_6, %c0_7] : memref<8x128xf32, #tpu.memory_space<vmem>>, vector<8x128xf32>
    tpu.vector_store %arg7[%c0_6, %c0_7], %7 {strides = array<i32>} : memref<8x128xf32, #tpu.memory_space<vmem>>, vector<8x128xf32>,
    %c3_i32 = arith.constant 3 : i32
    %9 = arith.cmpi eq, %arg2, %c3_i32 : i32
    %10 = arith.extui %9 : i1 to i32
    %c0_i32_8 = arith.constant 0 : i32
    %11 = arith.cmpi ne, %10, %c0_i32_8 : i32
    scf.if %11 {
      %c0_9 = arith.constant 0 : index
      %c0_10 = arith.constant 0 : index
      %12 = vector.load %arg7[%c0_9, %c0_10] : memref<8x128xf32, #tpu.memory_space<vmem>>, vector<8x128xf32>
      %c0_11 = arith.constant 0 : index
      %c0_12 = arith.constant 0 : index
      %13 = vector.load %arg5[%c0_11, %c0_12] : memref<1x128xf32, #tpu.memory_space<vmem>>, vector<1x128xf32>
      %14 = vector.broadcast %13 : vector<1x128xf32> to vector<8x128xf32>
      %15 = arith.addf %12, %14 : vector<8x128xf32>
      %c0_13 = arith.constant 0 : index
      %c0_14 = arith.constant 0 : index
      %16 = vector.load %arg6[%c0_13, %c0_14] : memref<8x128xf32, #tpu.memory_space<vmem>>, vector<8x128xf32>
      tpu.vector_store %arg6[%c0_13, %c0_14], %15 {strides = array<i32>} : memref<8x128xf32, #tpu.memory_space<vmem>>, vector<8x128xf32>,
    } else {
    }
    return
  }
  func.func @transform_0(%arg0: i32, %arg1: i32, %arg2: i32) -> (i32, i32) {
    %c0_i32 = arith.constant 0 : i32
    return %arg1, %arg2 : i32, i32
  }
  func.func @transform_1(%arg0: i32, %arg1: i32, %arg2: i32) -> (i32, i32) {
    %c0_i32 = arith.constant 0 : i32
    return %arg2, %arg0 : i32, i32
  }
  func.func @transform_2(%arg0: i32, %arg1: i32, %arg2: i32) -> (i32, i32) {
    %c0_i32 = arith.constant 0 : i32
    %c0_i32_0 = arith.constant 0 : i32
    return %c0_i32, %arg0 : i32, i32
  }
  func.func @transform_3(%arg0: i32, %arg1: i32, %arg2: i32) -> (i32, i32) {
    %c0_i32 = arith.constant 0 : i32
    return %arg1, %arg0 : i32, i32
  }
}

</mosaic_0001>

<bundles_post_ra>
// kernel: _lambda_.8
= control target key start
LH: loop header
LB: loop body
LE: loop exit
PB: predicated region body
PF: predicated region fallthrough
CT: control target
= control target key end

     0   :  { %s1276_s12 = smov 0   ;;  %s1278_s13 = smov 0   ;;  %s1426_s0 = inlined_call_operand.vmem [shape: bf16[512,128], index: 0, kind: input, shape index: {}]   ;;  %s1427_s1 = inlined_call_operand.vmem [shape: bf16[128,128], index: 1, kind: input, shape index: {}]   ;;  %s1428_s2 = inlined_call_operand.vmem [shape: f32[1,128], index: 2, kind: input, shape index: {}]   ;;  %s1429_s3 = inlined_call_operand.vmem [shape: f32[512,128], index: 3, kind: output, shape index: {}]  }
   0x1   :  { %s1280_s14 = smov 0  }
   0x2 LB: > { %s28_s15 = sadd.s32 1, %s1250_s13  ;;  %p1064_p0 = scmp.ge.s32.totalorder %s1254_s14, 1  ;;  %s1254_s14 = sphi %s1280_s14, %s13_s14   ;;  %s1250_s13 = sphi %s1278_s13, %s1431_s13   ;;  %s1246_s12 = sphi %s1276_s12, %s1430_s12  }
   0x3   : > { %p30_p1 = scmp.ge.s32.totalorder %s28_s15, 2  ;;  %p188_p2 = scmp.lt.s32.totalorder %s1254_s14, 3 }
   0x5   : > { %s1433_s15 = smov (%p30_p1, %s28_s15), 0  ;;  %p189_p3 = pnand %p1064_p0, %p188_p2 }
   0x6   : > { %s1065_s18 = sshll.u32 (!%p189_p3), %s1246_s12, 5 }
   0x7   : > { %192 = sbr.rel (%p189_p3) target bundleno = 275 (0x113), region = 32  ;;  %p230_p4 = scmp.lt.s32.totalorder (!%p189_p3), %s1065_s18, 63 }
   0xc   : > { %v1208_v0 = vld [vmem:[%s1427_s1 + $0x38] sm:$0xff]   ;;  %v1209_v1 = vld [vmem:[%s1427_s1 + $0x30] sm:$0xff]   ;;  %s1435_s18 = smov (!%p230_p4, %s1065_s18), 63  ;;  %v1210_v2 = vld [vmem:[%s1427_s1 + $0x28] sm:$0xff]  }
   0xd   : > { %1120 = vmatprep.subr.bf16.mxu0 %v1208_v0  ;;  %1168 = vmatprep.subr.bf16.mxu1 %v1208_v0  ;;  %s1066_s23 = sshll.u32 %s1435_s18, 2  ;;  %v1211_v3 = vld [vmem:[%s1427_s1 + $0x20] sm:$0xff]   ;;  %v1212_v6 = vld [vmem:[%s1427_s1 + $0x18] sm:$0xff]   ;;  %v1213_v7 = vld [vmem:[%s1427_s1 + $0x10] sm:$0xff]   ;;  %s1068_s12 = sshll.u32 %s1435_s18, 3 }
   0xe   : > { %1121 = vmatpush3.bf16.msra.mxu0 %v1208_v0  ;;  %1176 = vmatpush3.bf16.msra.mxu1 %v1208_v0  ;;  %s1309_s26 = scalar_lea.vmem %s1426_s0, %s1066_s23  ;;  %v1214_v8 = vld [vmem:[%s1427_s1 + $0x8] sm:$0xff]   ;;  %v1215_v9 = vld [vmem:[%s1427_s1] sm:$0xff]   ;;  %s1353_s19 = scalar_lea.vmem %s1429_s3, %s1068_s12 }
   0xf   : > { %1122 = vmatprep.subr.bf16.mxu0 %v1209_v1  ;;  %1169 = vmatprep.subr.bf16.mxu1 %v1209_v1  ;;  %v1216_v4 = vld [vmem:[%s1309_s26] sm:$0xff]   ;;  %v1218_v10 = vld [vmem:[%s1309_s26 + $0x8] sm:$0xff]   ;;  %v1220_v12 = vld [vmem:[%s1309_s26 + $0x10] sm:$0xff]  }
  0x10   : > { %v1217_v5 = vld [vmem:[%s1309_s26 + $0x40] sm:$0xff]   ;;  %1136 = vmatprep.mubr.bf16.mxu0 %v1216_v4  ;;  %v1219_v11 = vld [vmem:[%s1309_s26 + $0x48] sm:$0xff]   ;;  %v1221_v13 = vld [vmem:[%s1309_s26 + $0x50] sm:$0xff]  }
  0x11   : > { %1152 = vmatprep.mubr.bf16.mxu1 %v1217_v5  ;;  %v1222_v14 = vld [vmem:[%s1309_s26 + $0x18] sm:$0xff]   ;;  %v1224_v16 = vld [vmem:[%s1309_s26 + $0x20] sm:$0xff]   ;;  %v1226_v18 = vld [vmem:[%s1309_s26 + $0x28] sm:$0xff]  }
  0x12   : > { %1123 = vmatpush3.bf16.msra.mxu0 %v1209_v1  ;;  %1177 = vmatpush3.bf16.msra.mxu1 %v1209_v1  ;;  %v1223_v15 = vld [vmem:[%s1309_s26 + $0x58] sm:$0xff]   ;;  %v1225_v17 = vld [vmem:[%s1309_s26 + $0x60] sm:$0xff]   ;;  %v1227_v19 = vld [vmem:[%s1309_s26 + $0x68] sm:$0xff]  }
  0x13   : > { %1124 = vmatprep.subr.bf16.mxu0 %v1210_v2  ;;  %1170 = vmatprep.subr.bf16.mxu1 %v1210_v2  ;;  %v1228_v20 = vld [vmem:[%s1309_s26 + $0x30] sm:$0xff]   ;;  %v1230_v22 = vld [vmem:[%s1309_s26 + $0x38] sm:$0xff]   ;;  %v1345_v24 = vld [vmem:[%s1428_s2] ss:$0 sm:$0xff] }
  0x14   : > { %v1229_v21 = vld [vmem:[%s1309_s26 + $0x70] sm:$0xff]   ;;  %v1231_v23 = vld [vmem:[%s1309_s26 + $0x78] sm:$0xff]  }
  0x16   : > { %1125 = vmatpush3.bf16.msra.mxu0 %v1210_v2  ;;  %1178 = vmatpush3.bf16.msra.mxu1 %v1210_v2 }
  0x17   : > { %1126 = vmatprep.subr.bf16.mxu0 %v1211_v3  ;;  %1171 = vmatprep.subr.bf16.mxu1 %v1211_v3 }
  0x1a   : > { %1127 = vmatpush3.bf16.msra.mxu0 %v1211_v3  ;;  %1179 = vmatpush3.bf16.msra.mxu1 %v1211_v3 }
  0x1b   : > { %1128 = vmatprep.subr.bf16.mxu0 %v1212_v6  ;;  %1172 = vmatprep.subr.bf16.mxu1 %v1212_v6 }
  0x1e   : > { %1129 = vmatpush3.bf16.msra.mxu0 %v1212_v6  ;;  %1180 = vmatpush3.bf16.msra.mxu1 %v1212_v6 }
  0x1f   : > { %1130 = vmatprep.subr.bf16.mxu0 %v1213_v7  ;;  %1173 = vmatprep.subr.bf16.mxu1 %v1213_v7 }
  0x22   : > { %1131 = vmatpush3.bf16.msra.mxu0 %v1213_v7  ;;  %1181 = vmatpush3.bf16.msra.mxu1 %v1213_v7 }
  0x23   : > { %1132 = vmatprep.subr.bf16.mxu0 %v1214_v8  ;;  %1174 = vmatprep.subr.bf16.mxu1 %v1214_v8 }
  0x26   : > { %1133 = vmatpush3.bf16.msra.mxu0 %v1214_v8  ;;  %1182 = vmatpush3.bf16.msra.mxu1 %v1214_v8 }
  0x27   : > { %1134 = vmatprep.subr.bf16.mxu0 %v1215_v9  ;;  %1175 = vmatprep.subr.bf16.mxu1 %v1215_v9 }
  0x2a   : > { %1135 = vmatpush3.bf16.msra.mxu0 %v1215_v9  ;;  %1183 = vmatpush3.bf16.msra.mxu1 %v1215_v9 }
  0x2d   : > { %1137 = vmatmul.mubr.bf16.vlgmr.msra.gmra.mxu0 %v1218_v10  ;;  %1153 = vmatmul.mubr.bf16.vlgmr.msra.gmra.mxu1 %v1219_v11 }
  0x2e   : > { %1140 = vmatprep.mubr.bf16.mxu0 %v1220_v12  ;;  %1156 = vmatprep.mubr.bf16.mxu1 %v1221_v13 }
  0x35   : > { %1141 = vmatmul.mubr.bf16.gmra.mxu0 %v1222_v14  ;;  %1157 = vmatmul.mubr.bf16.gmra.mxu1 %v1223_v15 }
  0x36   : > { %1144 = vmatprep.mubr.bf16.mxu0 %v1224_v16  ;;  %1160 = vmatprep.mubr.bf16.mxu1 %v1225_v17 }
  0x3d   : > { %1145 = vmatmul.mubr.bf16.gmra.mxu0 %v1226_v18  ;;  %1161 = vmatmul.mubr.bf16.gmra.mxu1 %v1227_v19 }
  0x3e   : > { %1148 = vmatprep.mubr.bf16.mxu0 %v1228_v20  ;;  %1164 = vmatprep.mubr.bf16.mxu1 %v1229_v21 }
  0x45   : > { %1149 = vmatmul.mubr.bf16.gmra.mxu0 %v1230_v22  ;;  %1165 = vmatmul.mubr.bf16.gmra.mxu1 %v1231_v23 }
  0xed   : > { %v1138_v25 = vpop.f32.mrf.mxu0  ;;  %v1154_v26 = vpop.f32.mrf.mxu1 }
  0xee   : > { %v789_v27 = vadd.f32 %v1138_v25, %v1345_v24  ;;  %v805_v28 = vadd.f32 %v1154_v26, %v1345_v24 }
  0xef   : > { %v554_v29 = vpop.f32.mrf.mxu0  ;;  %v618_v30 = vpop.f32.mrf.mxu1 }
  0xf0   : > { %vm821_vm0 = vcmp.ge.f32.partialorder %v789_v27, 0.0  ;;  %v853_v31 = vmul.f32 0.2, %v789_v27  ;;  %vm837_vm1 = vcmp.ge.f32.partialorder %v805_v28, 0.0  ;;  %v869_v32 = vmul.f32 0.2, %v805_v28 }
  0xf1   : > { %v787_v33 = vadd.f32 %v1345_v24, %v554_v29  ;;  %v803_v34 = vadd.f32 %v1345_v24, %v618_v30  ;;  %v1139_v35 = vpop.f32.mrf.mxu0  ;;  %v1155_v36 = vpop.f32.mrf.mxu1 }
  0xf2   : > { %v885_v37 = vsel %vm821_vm0, %v789_v27, %v853_v31  ;;  %v901_v38 = vsel %vm837_vm1, %v805_v28, %v869_v32  ;;  %v790_v39 = vadd.f32 %v1139_v35, %v1345_v24  ;;  %v806_v40 = vadd.f32 %v1155_v36, %v1345_v24 }
  0xf3   : > { %917 = vst [vmem:[%s1353_s19 + $0x10] sm:$0xff] %v885_v37  ;;  %933 = vst [vmem:[%s1353_s19 + $0x90] sm:$0xff] %v901_v38  ;;  %vm819_vm2 = vcmp.ge.f32.partialorder %v787_v33, 0.0  ;;  %v851_v41 = vmul.f32 0.2, %v787_v33  ;;  %vm835_vm3 = vcmp.ge.f32.partialorder %v803_v34, 0.0  ;;  %v557_v43 = vpop.f32.mrf.mxu0  ;;  %v621_v44 = vpop.f32.mrf.mxu1 }
  0xf4   : > { %v867_v42 = vmul.f32 0.2, %v803_v34  ;;  %vm822_vm4 = vcmp.ge.f32.partialorder %v790_v39, 0.0  ;;  %v854_v45 = vmul.f32 0.2, %v790_v39  ;;  %vm838_vm5 = vcmp.ge.f32.partialorder %v806_v40, 0.0 }
  0xf5   : > { %v870_v46 = vmul.f32 0.2, %v806_v40  ;;  %v883_v47 = vsel %vm819_vm2, %v787_v33, %v851_v41  ;;  %v788_v49 = vadd.f32 %v1345_v24, %v557_v43  ;;  %v804_v50 = vadd.f32 %v1345_v24, %v621_v44  ;;  %v1142_v51 = vpop.f32.mrf.mxu0  ;;  %v1158_v52 = vpop.f32.mrf.mxu1 }
  0xf6   : > { %v899_v48 = vsel %vm835_vm3, %v803_v34, %v867_v42  ;;  %915 = vst [vmem:[%s1353_s19] sm:$0xff] %v883_v47  ;;  %v886_v53 = vsel %vm822_vm4, %v790_v39, %v854_v45  ;;  %v793_v55 = vadd.f32 %v1142_v51, %v1345_v24  ;;  %v809_v56 = vadd.f32 %v1158_v52, %v1345_v24 }
  0xf7   : > { %931 = vst [vmem:[%s1353_s19 + $0x80] sm:$0xff] %v899_v48  ;;  %v902_v54 = vsel %vm838_vm5, %v806_v40, %v870_v46  ;;  %918 = vst [vmem:[%s1353_s19 + $0x18] sm:$0xff] %v886_v53  ;;  %vm820_vm6 = vcmp.ge.f32.partialorder %v788_v49, 0.0  ;;  %v852_v57 = vmul.f32 0.2, %v788_v49  ;;  %vm836_vm7 = vcmp.ge.f32.partialorder %v804_v50, 0.0  ;;  %v570_v59 = vpop.f32.mrf.mxu0  ;;  %v634_v60 = vpop.f32.mrf.mxu1 }
  0xf8   : > { %934 = vst [vmem:[%s1353_s19 + $0x98] sm:$0xff] %v902_v54  ;;  %v868_v58 = vmul.f32 0.2, %v804_v50  ;;  %vm825_vm8 = vcmp.ge.f32.partialorder %v793_v55, 0.0  ;;  %v857_v61 = vmul.f32 0.2, %v793_v55  ;;  %v791_v1 = vadd.f32 %v1345_v24, %v570_v59 }
  0xf9   : > { %vm841_vm9 = vcmp.ge.f32.partialorder %v809_v56, 0.0  ;;  %v873_v62 = vmul.f32 0.2, %v809_v56  ;;  %v884_v63 = vsel %vm820_vm6, %v788_v49, %v852_v57  ;;  %v807_v2 = vadd.f32 %v1345_v24, %v634_v60  ;;  %v1143_v3 = vpop.f32.mrf.mxu0  ;;  %v1159_v4 = vpop.f32.mrf.mxu1 }
  0xfa   : > { %v900_v0 = vsel %vm836_vm7, %v804_v50, %v868_v58  ;;  %916 = vst [vmem:[%s1353_s19 + $0x8] sm:$0xff] %v884_v63  ;;  %v889_v5 = vsel %vm825_vm8, %v793_v55, %v857_v61  ;;  %v794_v7 = vadd.f32 %v1143_v3, %v1345_v24  ;;  %v810_v8 = vadd.f32 %v1159_v4, %v1345_v24 }
  0xfb   : > { %932 = vst [vmem:[%s1353_s19 + $0x88] sm:$0xff] %v900_v0  ;;  %v905_v6 = vsel %vm841_vm9, %v809_v56, %v873_v62  ;;  %921 = vst [vmem:[%s1353_s19 + $0x30] sm:$0xff] %v889_v5  ;;  %vm823_vm10 = vcmp.ge.f32.partialorder %v791_v1, 0.0  ;;  %v855_v9 = vmul.f32 0.2, %v791_v1  ;;  %vm839_vm11 = vcmp.ge.f32.partialorder %v807_v2, 0.0  ;;  %v573_v11 = vpop.f32.mrf.mxu0  ;;  %v637_v12 = vpop.f32.mrf.mxu1 }
  0xfc   : > { %937 = vst [vmem:[%s1353_s19 + $0xb0] sm:$0xff] %v905_v6  ;;  %v871_v10 = vmul.f32 0.2, %v807_v2  ;;  %vm826_vm12 = vcmp.ge.f32.partialorder %v794_v7, 0.0  ;;  %v858_v13 = vmul.f32 0.2, %v794_v7  ;;  %v792_v17 = vadd.f32 %v1345_v24, %v573_v11 }
  0xfd   : > { %vm842_vm13 = vcmp.ge.f32.partialorder %v810_v8, 0.0  ;;  %v874_v14 = vmul.f32 0.2, %v810_v8  ;;  %v887_v15 = vsel %vm823_vm10, %v791_v1, %v855_v9  ;;  %v808_v18 = vadd.f32 %v1345_v24, %v637_v12  ;;  %v1146_v19 = vpop.f32.mrf.mxu0  ;;  %v1162_v20 = vpop.f32.mrf.mxu1 }
  0xfe   : > { %v903_v16 = vsel %vm839_vm11, %v807_v2, %v871_v10  ;;  %919 = vst [vmem:[%s1353_s19 + $0x20] sm:$0xff] %v887_v15  ;;  %v890_v21 = vsel %vm826_vm12, %v794_v7, %v858_v13  ;;  %v797_v23 = vadd.f32 %v1146_v19, %v1345_v24  ;;  %v813_v25 = vadd.f32 %v1162_v20, %v1345_v24 }
  0xff   : > { %935 = vst [vmem:[%s1353_s19 + $0xa0] sm:$0xff] %v903_v16  ;;  %v906_v22 = vsel %vm842_vm13, %v810_v8, %v874_v14  ;;  %922 = vst [vmem:[%s1353_s19 + $0x38] sm:$0xff] %v890_v21  ;;  %vm824_vm14 = vcmp.ge.f32.partialorder %v792_v17, 0.0  ;;  %v856_v26 = vmul.f32 0.2, %v792_v17  ;;  %vm840_vm15 = vcmp.ge.f32.partialorder %v808_v18, 0.0  ;;  %v586_v28 = vpop.f32.mrf.mxu0  ;;  %v650_v29 = vpop.f32.mrf.mxu1 }
 0x100   : > { %938 = vst [vmem:[%s1353_s19 + $0xb8] sm:$0xff] %v906_v22  ;;  %v872_v27 = vmul.f32 0.2, %v808_v18  ;;  %vm829_vm0 = vcmp.ge.f32.partialorder %v797_v23, 0.0  ;;  %v861_v30 = vmul.f32 0.2, %v797_v23  ;;  %v795_v34 = vadd.f32 %v1345_v24, %v586_v28 }
 0x101   : > { %vm845_vm1 = vcmp.ge.f32.partialorder %v813_v25, 0.0  ;;  %v877_v31 = vmul.f32 0.2, %v813_v25  ;;  %v888_v32 = vsel %vm824_vm14, %v792_v17, %v856_v26  ;;  %v811_v35 = vadd.f32 %v1345_v24, %v650_v29  ;;  %v1147_v36 = vpop.f32.mrf.mxu0  ;;  %v1163_v37 = vpop.f32.mrf.mxu1 }
 0x102   : > { %v904_v33 = vsel %vm840_vm15, %v808_v18, %v872_v27  ;;  %920 = vst [vmem:[%s1353_s19 + $0x28] sm:$0xff] %v888_v32  ;;  %v893_v38 = vsel %vm829_vm0, %v797_v23, %v861_v30  ;;  %v798_v40 = vadd.f32 %v1147_v36, %v1345_v24  ;;  %v814_v41 = vadd.f32 %v1163_v37, %v1345_v24 }
 0x103   : > { %936 = vst [vmem:[%s1353_s19 + $0xa8] sm:$0xff] %v904_v33  ;;  %v909_v39 = vsel %vm845_vm1, %v813_v25, %v877_v31  ;;  %925 = vst [vmem:[%s1353_s19 + $0x50] sm:$0xff] %v893_v38  ;;  %vm827_vm2 = vcmp.ge.f32.partialorder %v795_v34, 0.0  ;;  %v859_v42 = vmul.f32 0.2, %v795_v34  ;;  %vm843_vm3 = vcmp.ge.f32.partialorder %v811_v35, 0.0  ;;  %v589_v44 = vpop.f32.mrf.mxu0  ;;  %v653_v45 = vpop.f32.mrf.mxu1 }
 0x104   : > { %941 = vst [vmem:[%s1353_s19 + $0xd0] sm:$0xff] %v909_v39  ;;  %v875_v43 = vmul.f32 0.2, %v811_v35  ;;  %vm830_vm4 = vcmp.ge.f32.partialorder %v798_v40, 0.0  ;;  %v862_v46 = vmul.f32 0.2, %v798_v40  ;;  %v796_v50 = vadd.f32 %v1345_v24, %v589_v44 }
 0x105   : > { %vm846_vm5 = vcmp.ge.f32.partialorder %v814_v41, 0.0  ;;  %v878_v47 = vmul.f32 0.2, %v814_v41  ;;  %v891_v48 = vsel %vm827_vm2, %v795_v34, %v859_v42  ;;  %v812_v51 = vadd.f32 %v1345_v24, %v653_v45  ;;  %v1150_v52 = vpop.f32.mrf.mxu0  ;;  %v1166_v53 = vpop.f32.mrf.mxu1 }
 0x106   : > { %v907_v49 = vsel %vm843_vm3, %v811_v35, %v875_v43  ;;  %923 = vst [vmem:[%s1353_s19 + $0x40] sm:$0xff] %v891_v48  ;;  %v894_v54 = vsel %vm830_vm4, %v798_v40, %v862_v46  ;;  %v801_v56 = vadd.f32 %v1150_v52, %v1345_v24  ;;  %v817_v57 = vadd.f32 %v1166_v53, %v1345_v24 }
 0x107   : > { %939 = vst [vmem:[%s1353_s19 + $0xc0] sm:$0xff] %v907_v49  ;;  %v910_v55 = vsel %vm846_vm5, %v814_v41, %v878_v47  ;;  %926 = vst [vmem:[%s1353_s19 + $0x58] sm:$0xff] %v894_v54  ;;  %vm828_vm6 = vcmp.ge.f32.partialorder %v796_v50, 0.0  ;;  %v860_v58 = vmul.f32 0.2, %v796_v50  ;;  %vm844_vm7 = vcmp.ge.f32.partialorder %v812_v51, 0.0  ;;  %v602_v60 = vpop.f32.mrf.mxu0  ;;  %v666_v61 = vpop.f32.mrf.mxu1 }
 0x108   : > { %942 = vst [vmem:[%s1353_s19 + $0xd8] sm:$0xff] %v910_v55  ;;  %v876_v59 = vmul.f32 0.2, %v812_v51  ;;  %vm833_vm8 = vcmp.ge.f32.partialorder %v801_v56, 0.0  ;;  %v865_v62 = vmul.f32 0.2, %v801_v56  ;;  %v799_v2 = vadd.f32 %v1345_v24, %v602_v60 }
 0x109   : > { %vm849_vm9 = vcmp.ge.f32.partialorder %v817_v57, 0.0  ;;  %v881_v63 = vmul.f32 0.2, %v817_v57  ;;  %v892_v0 = vsel %vm828_vm6, %v796_v50, %v860_v58  ;;  %v815_v3 = vadd.f32 %v1345_v24, %v666_v61  ;;  %v1151_v4 = vpop.f32.mrf.mxu0  ;;  %v1167_v5 = vpop.f32.mrf.mxu1 }
 0x10a   : > { %v908_v1 = vsel %vm844_vm7, %v812_v51, %v876_v59  ;;  %924 = vst [vmem:[%s1353_s19 + $0x48] sm:$0xff] %v892_v0  ;;  %v897_v6 = vsel %vm833_vm8, %v801_v56, %v865_v62  ;;  %v802_v8 = vadd.f32 %v1151_v4, %v1345_v24  ;;  %v818_v9 = vadd.f32 %v1167_v5, %v1345_v24 }
 0x10b   : > { %940 = vst [vmem:[%s1353_s19 + $0xc8] sm:$0xff] %v908_v1  ;;  %v913_v7 = vsel %vm849_vm9, %v817_v57, %v881_v63  ;;  %929 = vst [vmem:[%s1353_s19 + $0x70] sm:$0xff] %v897_v6  ;;  %vm831_vm10 = vcmp.ge.f32.partialorder %v799_v2, 0.0  ;;  %v863_v10 = vmul.f32 0.2, %v799_v2  ;;  %vm847_vm11 = vcmp.ge.f32.partialorder %v815_v3, 0.0  ;;  %v605_v12 = vpop.f32.mrf.mxu0  ;;  %v669_v13 = vpop.f32.mrf.mxu1 }
 0x10c   : > { %945 = vst [vmem:[%s1353_s19 + $0xf0] sm:$0xff] %v913_v7  ;;  %v879_v11 = vmul.f32 0.2, %v815_v3  ;;  %vm834_vm12 = vcmp.ge.f32.partialorder %v802_v8, 0.0  ;;  %v866_v14 = vmul.f32 0.2, %v802_v8  ;;  %v800_v18 = vadd.f32 %v1345_v24, %v605_v12 }
 0x10d   : > { %vm850_vm13 = vcmp.ge.f32.partialorder %v818_v9, 0.0  ;;  %v882_v15 = vmul.f32 0.2, %v818_v9  ;;  %v895_v16 = vsel %vm831_vm10, %v799_v2, %v863_v10  ;;  %v816_v19 = vadd.f32 %v1345_v24, %v669_v13 }
 0x10e   : > { %v911_v17 = vsel %vm847_vm11, %v815_v3, %v879_v11  ;;  %927 = vst [vmem:[%s1353_s19 + $0x60] sm:$0xff] %v895_v16  ;;  %v898_v20 = vsel %vm834_vm12, %v802_v8, %v866_v14  ;;  %vm832_vm14 = vcmp.ge.f32.partialorder %v800_v18, 0.0  ;;  %v864_v22 = vmul.f32 0.2, %v800_v18 }
 0x10f   : > { %943 = vst [vmem:[%s1353_s19 + $0xe0] sm:$0xff] %v911_v17  ;;  %v914_v21 = vsel %vm850_vm13, %v818_v9, %v882_v15  ;;  %930 = vst [vmem:[%s1353_s19 + $0x78] sm:$0xff] %v898_v20  ;;  %vm848_vm15 = vcmp.ge.f32.partialorder %v816_v19, 0.0  ;;  %v880_v23 = vmul.f32 0.2, %v816_v19 }
 0x110   : > { %946 = vst [vmem:[%s1353_s19 + $0xf8] sm:$0xff] %v914_v21  ;;  %v896_v25 = vsel %vm832_vm14, %v800_v18, %v864_v22 }
 0x111   : > { %v912_v26 = vsel %vm848_vm15, %v816_v19, %v880_v23  ;;  %928 = vst [vmem:[%s1353_s19 + $0x68] sm:$0xff] %v896_v25 }
 0x112   : > { %944 = vst [vmem:[%s1353_s19 + $0xe8] sm:$0xff] %v912_v26 }
 0x113 PF: > { %s13_s14 = sadd.s32 1, %s1254_s14   ;;  %s1430_s12 = smov %s1250_s13 }
 0x114   : > { %p10_p5 = scmp.ge.s32.totalorder %s13_s14, 4   ;;  %s1431_s13 = smov %s1433_s15 }
 0x116   :  { %12 = sbr.rel (!%p10_p5) target bundleno = 2 (0x2), region = 76 }

// kernel: _lambda_.9
= control target key start
LH: loop header
LB: loop body
LE: loop exit
PB: predicated region body
PF: predicated region fallthrough
CT: control target
= control target key end

     0   :  { %v668_v32 = vmov 0.0   ;;  %vm503_vm0 = vcmask 1040384   ;;  %s866_s1 = inlined_call_operand.vmem [shape: bf16[256,128], index: 1, kind: input, shape index: {}]   ;;  %s867_s0 = inlined_call_operand.vmem [shape: bf16[128,256], index: 0, kind: input, shape index: {}]   ;;  %s868_s3 = inlined_call_operand.vmem [shape: f32[2,128], index: 3, kind: output, shape index: {1}]   ;;  %s869_s2 = inlined_call_operand.vmem [shape: f32[128,128], index: 2, kind: output, shape index: {0}]  }
   0x1   :  { %v628_v0 = vld [vmem:[%s866_s1 + $0x78] sm:$0xff]   ;;  %v630_v2 = vld [vmem:[%s866_s1 + $0x70] sm:$0xff]   ;;  %v632_v4 = vld [vmem:[%s866_s1 + $0x68] sm:$0xff]   ;;  %39 = vst [vmem:[%s868_s3] sm:$0x3] %v668_v32 }
   0x2   :  { %v629_v1 = vld [vmem:[%s866_s1 + $0x38] sm:$0xff]   ;;  %547 = vmatprep.subr.bf16.mxu0 %v628_v0  ;;  %611 = vmatprep.subr.bf16.mxu1 %v628_v0  ;;  %v631_v3 = vld [vmem:[%s866_s1 + $0x30] sm:$0xff]   ;;  %v633_v5 = vld [vmem:[%s866_s1 + $0x28] sm:$0xff]  }
   0x3   :  { %548 = vmatpush3.bf16.msra.mxu0 %v629_v1  ;;  %619 = vmatpush3.bf16.msra.mxu1 %v629_v1  ;;  %v634_v6 = vld [vmem:[%s866_s1 + $0x60] sm:$0xff]   ;;  %v636_v8 = vld [vmem:[%s866_s1 + $0x58] sm:$0xff]   ;;  %v638_v10 = vld [vmem:[%s866_s1 + $0x50] sm:$0xff]  }
   0x4   :  { %549 = vmatprep.subr.bf16.mxu0 %v630_v2  ;;  %612 = vmatprep.subr.bf16.mxu1 %v630_v2  ;;  %v635_v7 = vld [vmem:[%s866_s1 + $0x20] sm:$0xff]   ;;  %v637_v9 = vld [vmem:[%s866_s1 + $0x18] sm:$0xff]   ;;  %v639_v12 = vld [vmem:[%s866_s1 + $0x10] sm:$0xff]  }
   0x5   :  { %v646_v11 = vld [vmem:[%s867_s0 + $0x4] ss:$8 sps:$4 sm:$0xff]   ;;  %v644_v18 = vld [vmem:[%s867_s0] ss:$8 sps:$4 sm:$0xff]   ;;  %v647_v20 = vld [vmem:[%s867_s0 + $0x14] ss:$8 sps:$4 sm:$0xff]  }
   0x6   :  { %v652_v13 = vld [vmem:[%s867_s0 + $0x44] ss:$8 sps:$4 sm:$0xff]   ;;  %312 = vmatprep.mubr.bf16.mxu0 %v646_v11  ;;  %v650_v19 = vld [vmem:[%s867_s0 + $0x40] ss:$8 sps:$4 sm:$0xff]   ;;  %v656_v21 = vld [vmem:[%s867_s0 + $0x54] ss:$8 sps:$4 sm:$0xff]  }
   0x7   :  { %550 = vmatpush3.bf16.msra.mxu0 %v631_v3  ;;  %620 = vmatpush3.bf16.msra.mxu1 %v631_v3  ;;  %v640_v14 = vld [vmem:[%s866_s1 + $0x48] sm:$0xff]   ;;  %v642_v16 = vld [vmem:[%s866_s1 + $0x40] sm:$0xff]   ;;  %v649_v22 = vld [vmem:[%s867_s0 + $0x10] ss:$8 sps:$4 sm:$0xff]  }
   0x8   :  { %551 = vmatprep.subr.bf16.mxu0 %v632_v4  ;;  %613 = vmatprep.subr.bf16.mxu1 %v632_v4  ;;  %v641_v15 = vld [vmem:[%s866_s1 + $0x8] sm:$0xff]   ;;  %v643_v17 = vld [vmem:[%s866_s1] sm:$0xff]   ;;  %v658_v23 = vld [vmem:[%s867_s0 + $0x50] ss:$8 sps:$4 sm:$0xff]  }
   0x9   :  { %344 = vmatprep.mubr.bf16.mxu1 %v652_v13  ;;  %v653_v24 = vld [vmem:[%s867_s0 + $0x24] ss:$8 sps:$4 sm:$0xff]   ;;  %v655_v26 = vld [vmem:[%s867_s0 + $0x20] ss:$8 sps:$4 sm:$0xff]   ;;  %v659_v28 = vld [vmem:[%s867_s0 + $0x34] ss:$8 sps:$4 sm:$0xff]  }
   0xa   :  { %v662_v25 = vld [vmem:[%s867_s0 + $0x64] ss:$8 sps:$4 sm:$0xff]   ;;  %v664_v27 = vld [vmem:[%s867_s0 + $0x60] ss:$8 sps:$4 sm:$0xff]   ;;  %v665_v29 = vld [vmem:[%s867_s0 + $0x74] ss:$8 sps:$4 sm:$0xff]  }
   0xb   :  { %552 = vmatpush3.bf16.msra.mxu0 %v633_v5  ;;  %621 = vmatpush3.bf16.msra.mxu1 %v633_v5  ;;  %v661_v30 = vld [vmem:[%s867_s0 + $0x30] ss:$8 sps:$4 sm:$0xff]  }
   0xc   :  { %553 = vmatprep.subr.bf16.mxu0 %v634_v6  ;;  %614 = vmatprep.subr.bf16.mxu1 %v634_v6  ;;  %v667_v31 = vld [vmem:[%s867_s0 + $0x70] ss:$8 sps:$4 sm:$0xff]  }
   0xf   :  { %554 = vmatpush3.bf16.msra.mxu0 %v635_v7  ;;  %622 = vmatpush3.bf16.msra.mxu1 %v635_v7 }
  0x10   :  { %555 = vmatprep.subr.bf16.mxu0 %v636_v8  ;;  %615 = vmatprep.subr.bf16.mxu1 %v636_v8 }
  0x13   :  { %556 = vmatpush3.bf16.msra.mxu0 %v637_v9  ;;  %623 = vmatpush3.bf16.msra.mxu1 %v637_v9 }
  0x14   :  { %557 = vmatprep.subr.bf16.mxu0 %v638_v10  ;;  %616 = vmatprep.subr.bf16.mxu1 %v638_v10 }
  0x17   :  { %558 = vmatpush3.bf16.msra.mxu0 %v639_v12  ;;  %624 = vmatpush3.bf16.msra.mxu1 %v639_v12 }
  0x18   :  { %559 = vmatprep.subr.bf16.mxu0 %v640_v14  ;;  %617 = vmatprep.subr.bf16.mxu1 %v640_v14 }
  0x1b   :  { %560 = vmatpush3.bf16.msra.mxu0 %v641_v15  ;;  %625 = vmatpush3.bf16.msra.mxu1 %v641_v15 }
  0x1c   :  { %561 = vmatprep.subr.bf16.mxu0 %v642_v16  ;;  %618 = vmatprep.subr.bf16.mxu1 %v642_v16 }
  0x1f   :  { %562 = vmatpush3.bf16.msra.mxu0 %v643_v17  ;;  %626 = vmatpush3.bf16.msra.mxu1 %v643_v17 }
  0x22   :  { %313 = vmatmul.mubr.bf16.vlgmr.msra.gmra.mxu0 %v644_v18  ;;  %345 = vmatmul.mubr.bf16.vlgmr.msra.gmra.mxu1 %v650_v19 }
  0x23   :  { %320 = vmatprep.mubr.bf16.mxu0 %v647_v20  ;;  %352 = vmatprep.mubr.bf16.mxu1 %v656_v21 }
  0x2a   :  { %321 = vmatmul.mubr.bf16.gmra.mxu0 %v649_v22  ;;  %353 = vmatmul.mubr.bf16.gmra.mxu1 %v658_v23 }
  0x2b   :  { %328 = vmatprep.mubr.bf16.mxu0 %v653_v24  ;;  %360 = vmatprep.mubr.bf16.mxu1 %v662_v25 }
  0x32   :  { %329 = vmatmul.mubr.bf16.gmra.mxu0 %v655_v26  ;;  %361 = vmatmul.mubr.bf16.gmra.mxu1 %v664_v27 }
  0x33   :  { %336 = vmatprep.mubr.bf16.mxu0 %v659_v28  ;;  %368 = vmatprep.mubr.bf16.mxu1 %v665_v29 }
  0x3a   :  { %337 = vmatmul.mubr.bf16.gmra.mxu0 %v661_v30  ;;  %369 = vmatmul.mubr.bf16.gmra.mxu1 %v667_v31 }
  0xe2   :  { %v563_v33 = vpop.f32.mrf.mxu0  ;;  %v587_v34 = vpop.f32.mrf.mxu1 }
  0xe4   :  { %v564_v35 = vpop.f32.mrf.mxu0  ;;  %v588_v36 = vpop.f32.mrf.mxu1 }
  0xe5   :  { %v565_v37 = vadd.f32 %v564_v35, %v563_v33  ;;  %v788_v38 = vadd.f32 %v588_v36, %v587_v34 }
  0xe6   :  { %v566_v39 = vpop.f32.mrf.mxu0  ;;  %v590_v40 = vpop.f32.mrf.mxu1 }
  0xe7   :  { %428 = vst [vmem:[%s869_s2] sm:$0xff] %v565_v37  ;;  %436 = vst [vmem:[%s869_s2 + $0x40] sm:$0xff] %v788_v38  ;;  %v466_v0 = vmul.f32 %v565_v37, %v565_v37 }
  0xe8   :  { %v567_v41 = vpop.f32.mrf.mxu0  ;;  %v591_v42 = vpop.f32.mrf.mxu1 }
  0xe9   :  { %v568_v43 = vadd.f32 %v567_v41, %v566_v39  ;;  %v797_v44 = vadd.f32 %v591_v42, %v590_v40  ;;  %v474_v39 = vmul.f32 %v788_v38, %v788_v38 }
  0xea   :  { %v569_v45 = vpop.f32.mrf.mxu0  ;;  %v593_v46 = vpop.f32.mrf.mxu1 }
  0xeb   :  { %429 = vst [vmem:[%s869_s2 + $0x8] sm:$0xff] %v568_v43  ;;  %437 = vst [vmem:[%s869_s2 + $0x48] sm:$0xff] %v797_v44  ;;  %v467_v59 = vmul.f32 %v568_v43, %v568_v43  ;;  %v445_v4 = vadd.f32 %v568_v43, %v565_v37  ;;  %v475_v42 = vmul.f32 %v797_v44, %v797_v44 }
  0xec   :  { %v570_v47 = vpop.f32.mrf.mxu0  ;;  %v594_v48 = vpop.f32.mrf.mxu1 }
  0xed   :  { %v571_v49 = vadd.f32 %v570_v47, %v569_v45  ;;  %v806_v50 = vadd.f32 %v594_v48, %v593_v46  ;;  %v482_v5 = vadd.f32 %v467_v59, %v466_v0 }
  0xee   :  { %v572_v51 = vpop.f32.mrf.mxu0  ;;  %v596_v52 = vpop.f32.mrf.mxu1 }
  0xef   :  { %430 = vst [vmem:[%s869_s2 + $0x10] sm:$0xff] %v571_v49  ;;  %438 = vst [vmem:[%s869_s2 + $0x50] sm:$0xff] %v806_v50  ;;  %v468_v1 = vmul.f32 %v571_v49, %v571_v49  ;;  %v446_v9 = vadd.f32 %v571_v49, %v445_v4  ;;  %v476_v46 = vmul.f32 %v806_v50, %v806_v50 }
  0xf0   :  { %v573_v53 = vpop.f32.mrf.mxu0  ;;  %v597_v54 = vpop.f32.mrf.mxu1 }
  0xf1   :  { %v574_v55 = vadd.f32 %v573_v53, %v572_v51  ;;  %v815_v56 = vadd.f32 %v597_v54, %v596_v52  ;;  %v483_v12 = vadd.f32 %v482_v5, %v468_v1 }
  0xf2   :  { %v575_v57 = vpop.f32.mrf.mxu0  ;;  %v599_v58 = vpop.f32.mrf.mxu1 }
  0xf3   :  { %431 = vst [vmem:[%s869_s2 + $0x18] sm:$0xff] %v574_v55  ;;  %439 = vst [vmem:[%s869_s2 + $0x58] sm:$0xff] %v815_v56  ;;  %v469_v6 = vmul.f32 %v574_v55, %v574_v55  ;;  %v447_v15 = vadd.f32 %v574_v55, %v446_v9  ;;  %v477_v49 = vmul.f32 %v815_v56, %v815_v56  ;;  %v444_v9 = vld [vmem:[%s868_s3] sm:$0x3] }
  0xf4   :  { %v576_v60 = vpop.f32.mrf.mxu0  ;;  %v600_v61 = vpop.f32.mrf.mxu1 }
  0xf5   :  { %v577_v62 = vadd.f32 %v576_v60, %v575_v57  ;;  %v601_v63 = vadd.f32 %v600_v61, %v599_v58  ;;  %v484_v17 = vadd.f32 %v483_v12, %v469_v6 }
  0xf6   :  { %v578_v2 = vpop.f32.mrf.mxu0  ;;  %v602_v3 = vpop.f32.mrf.mxu1 }
  0xf7   :  { %432 = vst [vmem:[%s869_s2 + $0x20] sm:$0xff] %v577_v62  ;;  %440 = vst [vmem:[%s869_s2 + $0x60] sm:$0xff] %v601_v63  ;;  %v470_v16 = vmul.f32 %v577_v62, %v577_v62  ;;  %v448_v20 = vadd.f32 %v577_v62, %v447_v15 }
  0xf8   :  { %v579_v7 = vpop.f32.mrf.mxu0  ;;  %v603_v8 = vpop.f32.mrf.mxu1 }
  0xf9   :  { %v580_v10 = vadd.f32 %v579_v7, %v578_v2  ;;  %v604_v11 = vadd.f32 %v603_v8, %v602_v3  ;;  %v485_v26 = vadd.f32 %v484_v17, %v470_v16 }
  0xfa   :  { %v581_v13 = vpop.f32.mrf.mxu0  ;;  %v605_v14 = vpop.f32.mrf.mxu1 }
  0xfb   :  { %433 = vst [vmem:[%s869_s2 + $0x28] sm:$0xff] %v580_v10  ;;  %441 = vst [vmem:[%s869_s2 + $0x68] sm:$0xff] %v604_v11  ;;  %v471_v21 = vmul.f32 %v580_v10, %v580_v10  ;;  %v449_v27 = vadd.f32 %v580_v10, %v448_v20  ;;  %v479_v57 = vmul.f32 %v604_v11, %v604_v11 }
  0xfc   :  { %v582_v18 = vpop.f32.mrf.mxu0  ;;  %v606_v19 = vpop.f32.mrf.mxu1 }
  0xfd   :  { %v583_v22 = vadd.f32 %v582_v18, %v581_v13  ;;  %v607_v23 = vadd.f32 %v606_v19, %v605_v14  ;;  %v486_v31 = vadd.f32 %v485_v26, %v471_v21 }
  0xfe   :  { %v584_v24 = vpop.f32.mrf.mxu0  ;;  %v608_v25 = vpop.f32.mrf.mxu1 }
  0xff   :  { %434 = vst [vmem:[%s869_s2 + $0x30] sm:$0xff] %v583_v22  ;;  %v472_v28 = vmul.f32 %v583_v22, %v583_v22  ;;  %442 = vst [vmem:[%s869_s2 + $0x70] sm:$0xff] %v607_v23  ;;  %v450_v32 = vadd.f32 %v583_v22, %v449_v27  ;;  %v480_v60 = vmul.f32 %v607_v23, %v607_v23 }
 0x100   :  { %v585_v29 = vpop.f32.mrf.mxu0  ;;  %v609_v30 = vpop.f32.mrf.mxu1 }
 0x101   :  { %v586_v33 = vadd.f32 %v585_v29, %v584_v24  ;;  %v610_v34 = vadd.f32 %v609_v30, %v608_v25  ;;  %v487_v35 = vadd.f32 %v486_v31, %v472_v28 }
 0x103   :  { %435 = vst [vmem:[%s869_s2 + $0x38] sm:$0xff] %v586_v33  ;;  %v451_v36 = vadd.f32 %v586_v33, %v450_v32  ;;  %v473_v37 = vmul.f32 %v586_v33, %v586_v33  ;;  %443 = vst [vmem:[%s869_s2 + $0x78] sm:$0xff] %v610_v34  ;;  %v481_v0 = vmul.f32 %v610_v34, %v610_v34 }
 0x105   :  { %v452_v40 = vadd.f32 %v788_v38, %v451_v36  ;;  %v488_v41 = vadd.f32 %v487_v35, %v473_v37  ;;  %v478_v38 = vmul.f32 %v601_v63, %v601_v63 }
 0x107   :  { %v453_v43 = vadd.f32 %v797_v44, %v452_v40  ;;  %v489_v45 = vadd.f32 %v488_v41, %v474_v39 }
 0x109   :  { %v490_v47 = vadd.f32 %v489_v45, %v475_v42  ;;  %v454_v48 = vadd.f32 %v806_v50, %v453_v43 }
 0x10b   :  { %v455_v51 = vadd.f32 %v815_v56, %v454_v48  ;;  %v491_v52 = vadd.f32 %v490_v47, %v476_v46 }
 0x10d   :  { %v456_v53 = vadd.f32 %v601_v63, %v455_v51  ;;  %v492_v54 = vadd.f32 %v491_v52, %v477_v49 }
 0x10f   :  { %v457_v55 = vadd.f32 %v604_v11, %v456_v53  ;;  %v493_v58 = vadd.f32 %v492_v54, %v478_v38 }
 0x111   :  { %v494_v44 = vadd.f32 %v493_v58, %v479_v57  ;;  %v458_v59 = vadd.f32 %v607_v23, %v457_v55 }
 0x113   :  { %v495_v61 = vadd.f32 %v494_v44, %v480_v60  ;;  %v459_v62 = vadd.f32 %v610_v34, %v458_v59 }
 0x115   :  { %v460_v1 = vrot.slane %v459_v62, 4  ;;  %v496_v50 = vadd.f32 %v495_v61, %v481_v0 }
 0x117   :  { %v461_v2 = vadd.f32 %v460_v1, %v459_v62  ;;  %v497_v3 = vrot.slane %v496_v50, 4 }
 0x119   :  { %v462_v4 = vrot.slane %v461_v2, 2  ;;  %v498_v5 = vadd.f32 %v497_v3, %v496_v50 }
 0x11b   :  { %v463_v56 = vadd.f32 %v462_v4, %v461_v2  ;;  %v499_v6 = vrot.slane %v498_v5, 2 }
 0x11d   :  { %v464_v7 = vrot.slane %v463_v56, 1  ;;  %v500_v63 = vadd.f32 %v499_v6, %v498_v5 }
 0x11f   :  { %v501_v8 = vrot.slane %v500_v63, 1  ;;  %v465_v10 = vadd.f32 %v464_v7, %v463_v56 }
 0x121   :  { %v502_v11 = vadd.f32 %v501_v8, %v500_v63 }
 0x123   :  { %v504_v12 = vsel %vm503_vm0, %v465_v10, %v502_v11 }
 0x124   :  { %v505_v13 = vadd.f32 %v504_v12, %v444_v9 }
 0x126   :  { %506 = vst [vmem:[%s868_s3] sm:$0x3] %v505_v13 }

// kernel: _lambda_.10
= control target key start
LH: loop header
LB: loop body
LE: loop exit
PB: predicated region body
PF: predicated region fallthrough
CT: control target
= control target key end

     0   :  { %s305_s0 = inlined_call_operand.vmem [shape: f32[128,128], index: 0, kind: input, shape index: {}]   ;;  %s306_s1 = inlined_call_operand.vmem [shape: f32[1,128], index: 1, kind: input, shape index: {}]   ;;  %s307_s2 = inlined_call_operand.vmem [shape: f32[1,128], index: 2, kind: input, shape index: {}]   ;;  %s308_s3 = inlined_call_operand.vmem [shape: f32[128,128], index: 3, kind: output, shape index: {}]  }
   0x1   :  { %v14_v0 = vld [vmem:[%s305_s0] sm:$0xff]  ;;  %v15_v4 = vld [vmem:[%s305_s0 + $0x8] sm:$0xff]  ;;  %v16_v5 = vld [vmem:[%s305_s0 + $0x10] sm:$0xff] }
   0x2   :  { %v172_v1 = vld [vmem:[%s306_s1] ss:$0 sm:$0xff]  ;;  %v17_v6 = vld [vmem:[%s305_s0 + $0x18] sm:$0xff]  ;;  %v19_v11 = vld [vmem:[%s305_s0 + $0x28] sm:$0xff] }
   0x3   :  { %v177_v2 = vld [vmem:[%s307_s2] ss:$0 sm:$0xff]  ;;  %v37_v3 = vmul.f32 %v172_v1, %v14_v0  ;;  %v38_v7 = vmul.f32 %v172_v1, %v15_v4  ;;  %v39_v8 = vmul.f32 %v172_v1, %v16_v5  ;;  %v40_v9 = vmul.f32 %v172_v1, %v17_v6  ;;  %v20_v12 = vld [vmem:[%s305_s0 + $0x30] sm:$0xff]  ;;  %v21_v17 = vld [vmem:[%s305_s0 + $0x38] sm:$0xff] }
   0x4   :  { %v18_v10 = vld [vmem:[%s305_s0 + $0x20] sm:$0xff]  ;;  %v42_v15 = vmul.f32 %v172_v1, %v19_v11  ;;  %v43_v16 = vmul.f32 %v172_v1, %v20_v12  ;;  %v44_v21 = vmul.f32 %v172_v1, %v21_v17  ;;  %v23_v30 = vld [vmem:[%s305_s0 + $0x48] sm:$0xff]  ;;  %v24_v31 = vld [vmem:[%s305_s0 + $0x50] sm:$0xff] }
   0x5   :  { %v60_v13 = vadd.f32 %v177_v2, %v37_v3  ;;  %v41_v14 = vmul.f32 %v172_v1, %v18_v10  ;;  %v61_v18 = vadd.f32 %v177_v2, %v38_v7  ;;  %v62_v19 = vadd.f32 %v177_v2, %v39_v8  ;;  %v22_v25 = vld [vmem:[%s305_s0 + $0x40] sm:$0xff]  ;;  %v25_v43 = vld [vmem:[%s305_s0 + $0x58] sm:$0xff]  ;;  %v27_v45 = vld [vmem:[%s305_s0 + $0x68] sm:$0xff] }
   0x6   :  { %v63_v20 = vadd.f32 %v177_v2, %v40_v9  ;;  %v65_v24 = vadd.f32 %v177_v2, %v42_v15  ;;  %v66_v37 = vadd.f32 %v177_v2, %v43_v16  ;;  %v67_v38 = vadd.f32 %v177_v2, %v44_v21  ;;  %v26_v44 = vld [vmem:[%s305_s0 + $0x60] sm:$0xff]  ;;  %v28_v56 = vld [vmem:[%s305_s0 + $0x70] sm:$0xff]  ;;  %v29_v4 = vld [vmem:[%s305_s0 + $0x78] sm:$0xff] }
   0x7   :  { %vm76_vm0 = vcmp.ge.f32.partialorder %v60_v13, 0.0  ;;  %v92_v22 = vmul.f32 0.2, %v60_v13  ;;  %v64_v23 = vadd.f32 %v177_v2, %v41_v14  ;;  %vm77_vm1 = vcmp.ge.f32.partialorder %v61_v18, 0.0 }
   0x8   :  { %v93_v26 = vmul.f32 0.2, %v61_v18  ;;  %vm78_vm2 = vcmp.ge.f32.partialorder %v62_v19, 0.0  ;;  %v94_v27 = vmul.f32 0.2, %v62_v19  ;;  %vm79_vm3 = vcmp.ge.f32.partialorder %v63_v20, 0.0 }
   0x9   :  { %v108_v28 = vsel %vm76_vm0, %v60_v13, %v92_v22  ;;  %v95_v29 = vmul.f32 0.2, %v63_v20  ;;  %vm80_vm4 = vcmp.ge.f32.partialorder %v64_v23, 0.0  ;;  %v96_v34 = vmul.f32 0.2, %v64_v23 }
   0xa   :  { %124 = vst [vmem:[%s308_s3] sm:$0xff] %v108_v28  ;;  %v109_v32 = vsel %vm77_vm1, %v61_v18, %v93_v26  ;;  %v110_v33 = vsel %vm78_vm2, %v62_v19, %v94_v27  ;;  %vm81_vm5 = vcmp.ge.f32.partialorder %v65_v24, 0.0  ;;  %v97_v36 = vmul.f32 0.2, %v65_v24 }
   0xb   :  { %125 = vst [vmem:[%s308_s3 + $0x8] sm:$0xff] %v109_v32  ;;  %126 = vst [vmem:[%s308_s3 + $0x10] sm:$0xff] %v110_v33  ;;  %v111_v35 = vsel %vm79_vm3, %v63_v20, %v95_v29  ;;  %v112_v39 = vsel %vm80_vm4, %v64_v23, %v96_v34  ;;  %v45_v40 = vmul.f32 %v172_v1, %v22_v25  ;;  %vm82_vm6 = vcmp.ge.f32.partialorder %v66_v37, 0.0 }
   0xc   :  { %127 = vst [vmem:[%s308_s3 + $0x18] sm:$0xff] %v111_v35  ;;  %v46_v41 = vmul.f32 %v172_v1, %v23_v30  ;;  %v47_v42 = vmul.f32 %v172_v1, %v24_v31  ;;  %128 = vst [vmem:[%s308_s3 + $0x20] sm:$0xff] %v112_v39  ;;  %v113_v46 = vsel %vm81_vm5, %v65_v24, %v97_v36  ;;  %v98_v47 = vmul.f32 0.2, %v66_v37 }
   0xd   :  { %vm83_vm7 = vcmp.ge.f32.partialorder %v67_v38, 0.0  ;;  %129 = vst [vmem:[%s308_s3 + $0x28] sm:$0xff] %v113_v46  ;;  %v99_v48 = vmul.f32 0.2, %v67_v38  ;;  %v68_v49 = vadd.f32 %v177_v2, %v45_v40  ;;  %v48_v53 = vmul.f32 %v172_v1, %v25_v43 }
   0xe   :  { %v69_v50 = vadd.f32 %v177_v2, %v46_v41  ;;  %v70_v51 = vadd.f32 %v177_v2, %v47_v42  ;;  %v114_v52 = vsel %vm82_vm6, %v66_v37, %v98_v47  ;;  %v49_v54 = vmul.f32 %v172_v1, %v26_v44 }
   0xf   :  { %v50_v55 = vmul.f32 %v172_v1, %v27_v45  ;;  %130 = vst [vmem:[%s308_s3 + $0x30] sm:$0xff] %v114_v52  ;;  %v115_v57 = vsel %vm83_vm7, %v67_v38, %v99_v48  ;;  %vm84_vm8 = vcmp.ge.f32.partialorder %v68_v49, 0.0  ;;  %v100_v58 = vmul.f32 0.2, %v68_v49 }
  0x10   :  { %vm85_vm9 = vcmp.ge.f32.partialorder %v69_v50, 0.0  ;;  %131 = vst [vmem:[%s308_s3 + $0x38] sm:$0xff] %v115_v57  ;;  %v101_v59 = vmul.f32 0.2, %v69_v50  ;;  %vm86_vm10 = vcmp.ge.f32.partialorder %v70_v51, 0.0  ;;  %v71_v61 = vadd.f32 %v177_v2, %v48_v53 }
  0x11   :  { %v102_v60 = vmul.f32 0.2, %v70_v51  ;;  %v116_v62 = vsel %vm84_vm8, %v68_v49, %v100_v58  ;;  %v72_v63 = vadd.f32 %v177_v2, %v49_v54  ;;  %v73_v0 = vadd.f32 %v177_v2, %v50_v55 }
  0x12   :  { %v51_v3 = vmul.f32 %v172_v1, %v28_v56  ;;  %132 = vst [vmem:[%s308_s3 + $0x40] sm:$0xff] %v116_v62  ;;  %v117_v5 = vsel %vm85_vm9, %v69_v50, %v101_v59  ;;  %vm87_vm11 = vcmp.ge.f32.partialorder %v71_v61, 0.0  ;;  %v103_v7 = vmul.f32 0.2, %v71_v61 }
  0x13   :  { %v118_v6 = vsel %vm86_vm10, %v70_v51, %v102_v60  ;;  %133 = vst [vmem:[%s308_s3 + $0x48] sm:$0xff] %v117_v5  ;;  %vm88_vm12 = vcmp.ge.f32.partialorder %v72_v63, 0.0  ;;  %v104_v8 = vmul.f32 0.2, %v72_v63  ;;  %vm89_vm13 = vcmp.ge.f32.partialorder %v73_v0, 0.0 }
  0x14   :  { %134 = vst [vmem:[%s308_s3 + $0x50] sm:$0xff] %v118_v6  ;;  %v105_v9 = vmul.f32 0.2, %v73_v0  ;;  %v119_v10 = vsel %vm87_vm11, %v71_v61, %v103_v7  ;;  %v74_v11 = vadd.f32 %v177_v2, %v51_v3  ;;  %v52_v12 = vmul.f32 %v172_v1, %v29_v4 }
  0x15   :  { %135 = vst [vmem:[%s308_s3 + $0x58] sm:$0xff] %v119_v10  ;;  %v120_v13 = vsel %vm88_vm12, %v72_v63, %v104_v8 }
  0x16   :  { %v121_v14 = vsel %vm89_vm13, %v73_v0, %v105_v9  ;;  %136 = vst [vmem:[%s308_s3 + $0x60] sm:$0xff] %v120_v13  ;;  %vm90_vm14 = vcmp.ge.f32.partialorder %v74_v11, 0.0  ;;  %v106_v15 = vmul.f32 0.2, %v74_v11  ;;  %v75_v16 = vadd.f32 %v177_v2, %v52_v12 }
  0x17   :  { %137 = vst [vmem:[%s308_s3 + $0x68] sm:$0xff] %v121_v14 }
  0x18   :  { %v122_v17 = vsel %vm90_vm14, %v74_v11, %v106_v15  ;;  %vm91_vm15 = vcmp.ge.f32.partialorder %v75_v16, 0.0  ;;  %v107_v1 = vmul.f32 0.2, %v75_v16 }
  0x19   :  { %138 = vst [vmem:[%s308_s3 + $0x70] sm:$0xff] %v122_v17 }
  0x1a   :  { %v123_v18 = vsel %vm91_vm15, %v75_v16, %v107_v1 }
  0x1b   :  { %139 = vst [vmem:[%s308_s3 + $0x78] sm:$0xff] %v123_v18 }

// kernel: _lambda_.11
= control target key start
LH: loop header
LB: loop body
LE: loop exit
PB: predicated region body
PF: predicated region fallthrough
CT: control target
= control target key end

     0   :  { %v629_v40 = vmov 0.0   ;;  %vm476_vm0 = vcmask 1040384   ;;  %s791_s1 = inlined_call_operand.vmem [shape: bf16[512,128], index: 1, kind: input, shape index: {}]   ;;  %s792_s0 = inlined_call_operand.vmem [shape: bf16[32,512], index: 0, kind: input, shape index: {}]   ;;  %s793_s3 = inlined_call_operand.vmem [shape: f32[2,128], index: 3, kind: output, shape index: {1}]   ;;  %s794_s2 = inlined_call_operand.vmem [shape: f32[32,128], index: 2, kind: output, shape index: {0}]  }
   0x1   :  { %v585_v0 = vld [vmem:[%s791_s1 + $0x78] sm:$0xff]   ;;  %v589_v4 = vld [vmem:[%s791_s1 + $0x70] sm:$0xff]   ;;  %v593_v8 = vld [vmem:[%s791_s1 + $0x68] sm:$0xff]   ;;  %27 = vst [vmem:[%s793_s3] sm:$0x3] %v629_v40 }
   0x2   :  { %v586_v1 = vld [vmem:[%s791_s1 + $0xf8] sm:$0xff]   ;;  %528 = vmatprep.subr.bf16.mxu0 %v585_v0  ;;  %v590_v5 = vld [vmem:[%s791_s1 + $0xf0] sm:$0xff]   ;;  %v594_v9 = vld [vmem:[%s791_s1 + $0xe8] sm:$0xff]  }
   0x3   :  { %v587_v2 = vld [vmem:[%s791_s1 + $0x38] sm:$0xff]   ;;  %556 = vmatprep.subr.bf16.mxu1 %v586_v1  ;;  %v591_v6 = vld [vmem:[%s791_s1 + $0x30] sm:$0xff]   ;;  %v595_v10 = vld [vmem:[%s791_s1 + $0x28] sm:$0xff]  }
   0x4   :  { %v588_v3 = vld [vmem:[%s791_s1 + $0xb8] sm:$0xff]   ;;  %529 = vmatpush3.bf16.msra.mxu0 %v587_v2  ;;  %v592_v7 = vld [vmem:[%s791_s1 + $0xb0] sm:$0xff]   ;;  %v596_v11 = vld [vmem:[%s791_s1 + $0xa8] sm:$0xff]  }
   0x5   :  { %557 = vmatpush3.bf16.msra.mxu1 %v588_v3  ;;  %530 = vmatprep.subr.bf16.mxu0 %v589_v4  ;;  %v597_v12 = vld [vmem:[%s791_s1 + $0x60] sm:$0xff]   ;;  %v601_v16 = vld [vmem:[%s791_s1 + $0x58] sm:$0xff]   ;;  %v605_v20 = vld [vmem:[%s791_s1 + $0x50] sm:$0xff]  }
   0x6   :  { %558 = vmatprep.subr.bf16.mxu1 %v590_v5  ;;  %v598_v13 = vld [vmem:[%s791_s1 + $0xe0] sm:$0xff]   ;;  %v602_v17 = vld [vmem:[%s791_s1 + $0xd8] sm:$0xff]   ;;  %v606_v21 = vld [vmem:[%s791_s1 + $0xd0] sm:$0xff]  }
   0x7   :  { %v599_v14 = vld [vmem:[%s791_s1 + $0x20] sm:$0xff]   ;;  %v603_v18 = vld [vmem:[%s791_s1 + $0x18] sm:$0xff]   ;;  %v607_v22 = vld [vmem:[%s791_s1 + $0x10] sm:$0xff]  }
   0x8   :  { %531 = vmatpush3.bf16.msra.mxu0 %v591_v6  ;;  %v600_v15 = vld [vmem:[%s791_s1 + $0xa0] sm:$0xff]   ;;  %v604_v19 = vld [vmem:[%s791_s1 + $0x98] sm:$0xff]   ;;  %v608_v23 = vld [vmem:[%s791_s1 + $0x90] sm:$0xff]  }
   0x9   :  { %559 = vmatpush3.bf16.msra.mxu1 %v592_v7  ;;  %532 = vmatprep.subr.bf16.mxu0 %v593_v8  ;;  %v609_v24 = vld [vmem:[%s791_s1 + $0x48] sm:$0xff]   ;;  %v613_v28 = vld [vmem:[%s791_s1 + $0x40] sm:$0xff]  }
   0xa   :  { %560 = vmatprep.subr.bf16.mxu1 %v594_v9  ;;  %v610_v25 = vld [vmem:[%s791_s1 + $0xc8] sm:$0xff]   ;;  %v614_v29 = vld [vmem:[%s791_s1 + $0xc0] sm:$0xff]  }
   0xb   :  { %v611_v26 = vld [vmem:[%s791_s1 + $0x8] sm:$0xff]   ;;  %v615_v30 = vld [vmem:[%s791_s1] sm:$0xff]  }
   0xc   :  { %533 = vmatpush3.bf16.msra.mxu0 %v595_v10  ;;  %v612_v27 = vld [vmem:[%s791_s1 + $0x88] sm:$0xff]   ;;  %v616_v31 = vld [vmem:[%s791_s1 + $0x80] sm:$0xff]  }
   0xd   :  { %561 = vmatpush3.bf16.msra.mxu1 %v596_v11  ;;  %534 = vmatprep.subr.bf16.mxu0 %v597_v12  ;;  %v617_v32 = vld [vmem:[%s792_s0] ss:$16 sps:$4 sm:$0xff]   ;;  %v619_v33 = vld [vmem:[%s792_s0 + $0x4] ss:$16 sps:$4 sm:$0xff]   ;;  %v620_v34 = vld [vmem:[%s792_s0 + $0x8] ss:$16 sps:$4 sm:$0xff]  }
   0xe   :  { %562 = vmatprep.subr.bf16.mxu1 %v598_v13  ;;  %v622_v35 = vld [vmem:[%s792_s0 + $0xc] ss:$16 sps:$4 sm:$0xff]   ;;  %368 = vmatprep.mubr.bf16.mxu0 %v619_v33  ;;  %v623_v36 = vld [vmem:[%s792_s0 + $0x24] ss:$16 sps:$4 sm:$0xff]   ;;  %v627_v38 = vld [vmem:[%s792_s0 + $0x20] ss:$16 sps:$4 sm:$0xff]  }
   0xf   :  { %417 = vmatprep.mubr.bf16.mxu1 %v622_v35  ;;  %v625_v37 = vld [vmem:[%s792_s0 + $0x2c] ss:$16 sps:$4 sm:$0xff]   ;;  %v628_v39 = vld [vmem:[%s792_s0 + $0x28] ss:$16 sps:$4 sm:$0xff]  }
  0x10   :  { %535 = vmatpush3.bf16.msra.mxu0 %v599_v14 }
  0x11   :  { %563 = vmatpush3.bf16.msra.mxu1 %v600_v15  ;;  %536 = vmatprep.subr.bf16.mxu0 %v601_v16 }
  0x12   :  { %564 = vmatprep.subr.bf16.mxu1 %v602_v17 }
  0x14   :  { %537 = vmatpush3.bf16.msra.mxu0 %v603_v18 }
  0x15   :  { %565 = vmatpush3.bf16.msra.mxu1 %v604_v19  ;;  %538 = vmatprep.subr.bf16.mxu0 %v605_v20 }
  0x16   :  { %566 = vmatprep.subr.bf16.mxu1 %v606_v21 }
  0x18   :  { %539 = vmatpush3.bf16.msra.mxu0 %v607_v22 }
  0x19   :  { %567 = vmatpush3.bf16.msra.mxu1 %v608_v23  ;;  %540 = vmatprep.subr.bf16.mxu0 %v609_v24 }
  0x1a   :  { %568 = vmatprep.subr.bf16.mxu1 %v610_v25  ;;  %v453_v25 = vld [vmem:[%s793_s3] sm:$0x3] }
  0x1c   :  { %541 = vmatpush3.bf16.msra.mxu0 %v611_v26 }
  0x1d   :  { %569 = vmatpush3.bf16.msra.mxu1 %v612_v27  ;;  %542 = vmatprep.subr.bf16.mxu0 %v613_v28 }
  0x1e   :  { %570 = vmatprep.subr.bf16.mxu1 %v614_v29 }
  0x20   :  { %543 = vmatpush3.bf16.msra.mxu0 %v615_v30 }
  0x21   :  { %571 = vmatpush3.bf16.msra.mxu1 %v616_v31 }
  0x23   :  { %369 = vmatmul.mubr.bf16.vlgmr.msra.gmra.mxu0 %v617_v32 }
  0x24   :  { %418 = vmatmul.mubr.bf16.vlgmr.msra.gmra.mxu1 %v620_v34  ;;  %376 = vmatprep.mubr.bf16.mxu0 %v623_v36 }
  0x25   :  { %425 = vmatprep.mubr.bf16.mxu1 %v625_v37 }
  0x2b   :  { %377 = vmatmul.mubr.bf16.gmra.mxu0 %v627_v38 }
  0x2c   :  { %426 = vmatmul.mubr.bf16.gmra.mxu1 %v628_v39 }
  0xe3   :  { %v544_v41 = vpop.f32.mrf.mxu0 }
  0xe4   :  { %v572_v42 = vpop.f32.mrf.mxu1 }
  0xe5   :  { %v545_v43 = vpop.f32.mrf.mxu0 }
  0xe6   :  { %v546_v44 = vadd.f32 %v545_v43, %v544_v41  ;;  %v573_v45 = vpop.f32.mrf.mxu1 }
  0xe7   :  { %v574_v46 = vadd.f32 %v573_v45, %v572_v42  ;;  %v547_v47 = vpop.f32.mrf.mxu0 }
  0xe8   :  { %v575_v48 = vpop.f32.mrf.mxu1 }
  0xe9   :  { %v420_v49 = vadd.f32 %v574_v46, %v546_v44  ;;  %v548_v50 = vpop.f32.mrf.mxu0 }
  0xea   :  { %v549_v51 = vadd.f32 %v548_v50, %v547_v47  ;;  %v576_v52 = vpop.f32.mrf.mxu1 }
  0xeb   :  { %449 = vst [vmem:[%s794_s2] sm:$0xff] %v420_v49  ;;  %v577_v53 = vadd.f32 %v576_v52, %v575_v48  ;;  %v550_v54 = vpop.f32.mrf.mxu0  ;;  %v463_v4 = vmul.f32 %v420_v49, %v420_v49 }
  0xec   :  { %v578_v55 = vpop.f32.mrf.mxu1 }
  0xed   :  { %v423_v56 = vadd.f32 %v577_v53, %v549_v51  ;;  %v551_v57 = vpop.f32.mrf.mxu0 }
  0xee   :  { %v552_v58 = vadd.f32 %v551_v57, %v550_v54  ;;  %v579_v59 = vpop.f32.mrf.mxu1 }
  0xef   :  { %450 = vst [vmem:[%s794_s2 + $0x8] sm:$0xff] %v423_v56  ;;  %v580_v60 = vadd.f32 %v579_v59, %v578_v55  ;;  %v553_v61 = vpop.f32.mrf.mxu0  ;;  %v464_v63 = vmul.f32 %v423_v56, %v423_v56  ;;  %v454_v5 = vadd.f32 %v423_v56, %v420_v49 }
  0xf0   :  { %v581_v62 = vpop.f32.mrf.mxu1 }
  0xf1   :  { %v428_v0 = vadd.f32 %v580_v60, %v552_v58  ;;  %v554_v1 = vpop.f32.mrf.mxu0  ;;  %v467_v8 = vadd.f32 %v464_v63, %v463_v4 }
  0xf2   :  { %v555_v2 = vadd.f32 %v554_v1, %v553_v61  ;;  %v582_v3 = vpop.f32.mrf.mxu1 }
  0xf3   :  { %451 = vst [vmem:[%s794_s2 + $0x10] sm:$0xff] %v428_v0  ;;  %v465_v6 = vmul.f32 %v428_v0, %v428_v0  ;;  %v583_v7 = vadd.f32 %v582_v3, %v581_v62  ;;  %v455_v9 = vadd.f32 %v454_v5, %v428_v0 }
  0xf5   :  { %v431_v10 = vadd.f32 %v583_v7, %v555_v2  ;;  %v468_v11 = vadd.f32 %v467_v8, %v465_v6 }
  0xf7   :  { %452 = vst [vmem:[%s794_s2 + $0x18] sm:$0xff] %v431_v10  ;;  %v456_v12 = vadd.f32 %v455_v9, %v431_v10  ;;  %v466_v13 = vmul.f32 %v431_v10, %v431_v10 }
  0xf9   :  { %v457_v14 = vrot.slane %v456_v12, 4  ;;  %v469_v15 = vadd.f32 %v468_v11, %v466_v13 }
  0xfb   :  { %v458_v16 = vadd.f32 %v457_v14, %v456_v12  ;;  %v470_v17 = vrot.slane %v469_v15, 4 }
  0xfd   :  { %v459_v18 = vrot.slane %v458_v16, 2  ;;  %v471_v19 = vadd.f32 %v470_v17, %v469_v15 }
  0xff   :  { %v460_v20 = vadd.f32 %v459_v18, %v458_v16  ;;  %v472_v21 = vrot.slane %v471_v19, 2 }
 0x101   :  { %v461_v22 = vrot.slane %v460_v20, 1  ;;  %v473_v23 = vadd.f32 %v472_v21, %v471_v19 }
 0x103   :  { %v474_v24 = vrot.slane %v473_v23, 1  ;;  %v462_v26 = vadd.f32 %v461_v22, %v460_v20 }
 0x105   :  { %v475_v27 = vadd.f32 %v474_v24, %v473_v23 }
 0x107   :  { %v477_v28 = vsel %vm476_vm0, %v462_v26, %v475_v27 }
 0x108   :  { %v478_v29 = vadd.f32 %v477_v28, %v453_v25 }
 0x10a   :  { %479 = vst [vmem:[%s793_s3] sm:$0x3] %v478_v29 }

// kernel: _lambda_.12
= control target key start
LH: loop header
LB: loop body
LE: loop exit
PB: predicated region body
PF: predicated region fallthrough
CT: control target
= control target key end

     0   :  { %s112_s0 = inlined_call_operand.vmem [shape: f32[32,128], index: 0, kind: input, shape index: {}]   ;;  %s113_s1 = inlined_call_operand.vmem [shape: f32[1,128], index: 1, kind: input, shape index: {}]   ;;  %s114_s2 = inlined_call_operand.vmem [shape: f32[1,128], index: 2, kind: input, shape index: {}]   ;;  %s115_s3 = inlined_call_operand.vmem [shape: f32[32,128], index: 3, kind: output, shape index: {}]  }
   0x1   :  { %v14_v0 = vld [vmem:[%s112_s0] sm:$0xff]  ;;  %v15_v4 = vld [vmem:[%s112_s0 + $0x8] sm:$0xff]  ;;  %v16_v5 = vld [vmem:[%s112_s0 + $0x10] sm:$0xff] }
   0x2   :  { %v60_v1 = vld [vmem:[%s113_s1] ss:$0 sm:$0xff]  ;;  %v17_v6 = vld [vmem:[%s112_s0 + $0x18] sm:$0xff] }
   0x3   :  { %v61_v2 = vld [vmem:[%s114_s2] ss:$0 sm:$0xff]  ;;  %v25_v3 = vmul.f32 %v60_v1, %v14_v0  ;;  %v26_v7 = vmul.f32 %v60_v1, %v15_v4  ;;  %v27_v8 = vmul.f32 %v60_v1, %v16_v5  ;;  %v28_v9 = vmul.f32 %v60_v1, %v17_v6 }
   0x5   :  { %v36_v10 = vadd.f32 %v61_v2, %v25_v3  ;;  %v37_v11 = vadd.f32 %v61_v2, %v26_v7  ;;  %v38_v12 = vadd.f32 %v61_v2, %v27_v8  ;;  %v39_v13 = vadd.f32 %v61_v2, %v28_v9 }
   0x7   :  { %vm40_vm0 = vcmp.ge.f32.partialorder %v36_v10, 0.0  ;;  %v44_v14 = vmul.f32 0.2, %v36_v10  ;;  %vm41_vm1 = vcmp.ge.f32.partialorder %v37_v11, 0.0  ;;  %v45_v15 = vmul.f32 0.2, %v37_v11 }
   0x8   :  { %vm42_vm2 = vcmp.ge.f32.partialorder %v38_v12, 0.0  ;;  %v46_v16 = vmul.f32 0.2, %v38_v12  ;;  %vm43_vm3 = vcmp.ge.f32.partialorder %v39_v13, 0.0  ;;  %v47_v18 = vmul.f32 0.2, %v39_v13 }
   0x9   :  { %v48_v17 = vsel %vm40_vm0, %v36_v10, %v44_v14  ;;  %v49_v19 = vsel %vm41_vm1, %v37_v11, %v45_v15 }
   0xa   :  { %52 = vst [vmem:[%s115_s3] sm:$0xff] %v48_v17  ;;  %v50_v20 = vsel %vm42_vm2, %v38_v12, %v46_v16  ;;  %53 = vst [vmem:[%s115_s3 + $0x8] sm:$0xff] %v49_v19  ;;  %v51_v21 = vsel %vm43_vm3, %v39_v13, %v47_v18 }
   0xb   :  { %54 = vst [vmem:[%s115_s3 + $0x10] sm:$0xff] %v50_v20  ;;  %55 = vst [vmem:[%s115_s3 + $0x18] sm:$0xff] %v51_v21 }

// kernel: _lambda_.14
= control target key start
LH: loop header
LB: loop body
LE: loop exit
PB: predicated region body
PF: predicated region fallthrough
CT: control target
= control target key end

     0   :  { %s99_s0 = inlined_call_operand.vmem [shape: f32[24,128], index: 0, kind: input, shape index: {}]   ;;  %s100_s1 = inlined_call_operand.vmem [shape: f32[1,128], index: 1, kind: input, shape index: {}]   ;;  %s101_s2 = inlined_call_operand.vmem [shape: f32[1,128], index: 2, kind: input, shape index: {}]   ;;  %s102_s3 = inlined_call_operand.vmem [shape: f32[24,128], index: 3, kind: output, shape index: {}]  }
   0x1   :  { %v14_v0 = vld [vmem:[%s99_s0] sm:$0xff]  ;;  %v15_v4 = vld [vmem:[%s99_s0 + $0x8] sm:$0xff]  ;;  %v16_v5 = vld [vmem:[%s99_s0 + $0x10] sm:$0xff] }
   0x2   :  { %v53_v1 = vld [vmem:[%s100_s1] ss:$0 sm:$0xff] }
   0x3   :  { %v54_v2 = vld [vmem:[%s101_s2] ss:$0 sm:$0xff]  ;;  %v24_v3 = vmul.f32 %v53_v1, %v14_v0  ;;  %v25_v6 = vmul.f32 %v53_v1, %v15_v4  ;;  %v26_v7 = vmul.f32 %v53_v1, %v16_v5 }
   0x5   :  { %v34_v8 = vadd.f32 %v54_v2, %v24_v3  ;;  %v35_v9 = vadd.f32 %v54_v2, %v25_v6  ;;  %v36_v10 = vadd.f32 %v54_v2, %v26_v7 }
   0x7   :  { %vm37_vm0 = vcmp.ge.f32.partialorder %v34_v8, 0.0  ;;  %v40_v11 = vmul.f32 0.2, %v34_v8  ;;  %vm38_vm1 = vcmp.ge.f32.partialorder %v35_v9, 0.0  ;;  %v41_v12 = vmul.f32 0.2, %v35_v9 }
   0x8   :  { %vm39_vm2 = vcmp.ge.f32.partialorder %v36_v10, 0.0  ;;  %v42_v13 = vmul.f32 0.2, %v36_v10 }
   0x9   :  { %v43_v14 = vsel %vm37_vm0, %v34_v8, %v40_v11  ;;  %v44_v15 = vsel %vm38_vm1, %v35_v9, %v41_v12 }
   0xa   :  { %46 = vst [vmem:[%s102_s3] sm:$0xff] %v43_v14  ;;  %v45_v16 = vsel %vm39_vm2, %v36_v10, %v42_v13  ;;  %47 = vst [vmem:[%s102_s3 + $0x8] sm:$0xff] %v44_v15 }
   0xb   :  { %48 = vst [vmem:[%s102_s3 + $0x10] sm:$0xff] %v45_v16 }

// kernel: _lambda_.13
= control target key start
LH: loop header
LB: loop body
LE: loop exit
PB: predicated region body
PF: predicated region fallthrough
CT: control target
= control target key end

     0   :  { %s1118_s12 = smov 0   ;;  %s1120_s13 = smov 0   ;;  %s1246_s0 = inlined_call_operand.vmem [shape: bf16[24,1024], index: 0, kind: input, shape index: {}]   ;;  %s1247_s1 = inlined_call_operand.vmem [shape: bf16[1024,128], index: 1, kind: input, shape index: {}]   ;;  %s1248_s2 = inlined_call_operand.vmem [shape: f32[24,128], index: 2, kind: output, shape index: {0}]   ;;  %s1249_s3 = inlined_call_operand.vmem [shape: f32[2,128], index: 3, kind: output, shape index: {1}]  }
   0x1   :  { %s1122_s14 = smov 0   ;;  %s1124_s15 = smov 0  }
   0x2   :  { %s1126_s16 = smov 0  }
   0x3 LB: > { %s26_s17 = sadd.s32 1, %s1090_s15  ;;  %p49_p1 = scmp.ne.s32.totalorder %s1082_s13, %s1078_s12  ;;  %s1094_s16 = sphi %s1126_s16, %s14_s16   ;;  %s1090_s15 = sphi %s1124_s15, %s1253_s15   ;;  %s1086_s14 = sphi %s1122_s14, %s1252_s14   ;;  %s1082_s13 = sphi %s1120_s13, %s1251_s13   ;;  %s1078_s12 = sphi %s1118_s12, %s1250_s12  }
   0x4   : > { %p27_p0 = scmp.ge.s32.totalorder %s26_s17, 2  ;;  %p50_p2 = scmp.eq.s32.totalorder %s1094_s16, 0 }
   0x5   : > { %s42_s19 = sadd.s32 1, %s1082_s13  ;;  %p858_p5 = scmp.ge.s32.totalorder %s1094_s16, 2 }
   0x6   : > { %s1255_s17 = smov (%p27_p0, %s26_s17), 0  ;;  %p51_p3 = por %p50_p2, %p49_p1 }
   0x7   : > { %s38_s18 = ssub.s32 %s1090_s15, %s1255_s17  ;;  %157 = sbr.rel (%p858_p5) target bundleno = 19 (0x13), region = 16 }
   0x8   : > { %p40_p4 = scmp.eq.s32.totalorder %s38_s18, 0 }
   0xa   : > { %s1153_s20 = scalar_select %p40_p4, %s1082_s13, %s42_s19  }
   0xc   : > { %160 = sbr.rel (!%p51_p3) target bundleno = 19 (0x13), region = 20  ;;  %s162_s21 = sand.u32 (%p51_p3), 1, %s1082_s13  }
   0xd   : > { %s912_s22 = sshll.u32 (%p51_p3), %s1090_s15, 4  ;;  %s970_s23 = smul.u32 (%p51_p3), 48, %s162_s21 }
   0xe   : > { %s170_s26 = scalar_lea.vmem (%p51_p3), %s1246_s0, %s912_s22 }
   0xf   : > { %v183_v0 = vld [vmem:[%s170_s26] sm:$0xff] (%p51_p3)  ;;  %v185_v1 = vld [vmem:[%s170_s26 + $0x8] sm:$0xff] (%p51_p3)  ;;  %s164_s27 = scalar_lea.vmem (%p51_p3), [#allocation3], %s970_s23 }
  0x10   : > { %v187_v2 = vld [vmem:[%s170_s26 + $0x20] sm:$0xff] (%p51_p3)  ;;  %v189_v3 = vld [vmem:[%s170_s26 + $0x28] sm:$0xff] (%p51_p3)  ;;  %184 = vst [vmem:[%s164_s27] sm:$0xff] (%p51_p3), %v183_v0  ;;  %186 = vst [vmem:[%s164_s27 + $0x8] sm:$0xff] (%p51_p3), %v185_v1 }
  0x11   : > { %v191_v4 = vld [vmem:[%s170_s26 + $0x40] sm:$0xff]  ;;  %v193_v5 = vld [vmem:[%s170_s26 + $0x48] sm:$0xff]  ;;  %188 = vst [vmem:[%s164_s27 + $0x10] sm:$0xff] %v187_v2  ;;  %190 = vst [vmem:[%s164_s27 + $0x18] sm:$0xff] %v189_v3 }
  0x12   : > { %192 = vst [vmem:[%s164_s27 + $0x20] sm:$0xff] %v191_v4  ;;  %194 = vst [vmem:[%s164_s27 + $0x28] sm:$0xff] %v193_v5 }
  0x13 PF: > { %p861_p6 = scmp.ge.s32.totalorder %s1094_s16, 1  ;;  %p211_p7 = scmp.lt.s32.totalorder %s1094_s16, 3 }
  0x15   : > { %p212_p8 = pnand %p861_p6, %p211_p7 }
  0x16   : > { %s218_s28 = sand.u32 (!%p212_p8), 1, %s1078_s12   ;;  %s862_s29 = sshll.u32 (!%p212_p8), %s1086_s14, 6 }
  0x17   : > { %215 = sbr.rel (%p212_p8) target bundleno = 313 (0x139), region = 47  ;;  %p259_p9 = scmp.lt.s32.totalorder (!%p212_p8), %s862_s29, 127 }
  0x18   : > { %s971_s30 = smul.u32 (!%p212_p8), 48, %s218_s28  ;;  %p281_p10 = scmp.eq.s32.totalorder (!%p212_p8), %s1086_s14, 0 }
  0x19   : > { %p864_p11 = scmp.ne.s32.totalorder (!%p212_p8), %s1086_s14, 0 }
  0x1a   : > { %s1171_s8 = scalar_lea.vmem (!%p212_p8), [#allocation3], %s971_s30 }
  0x1c   : > { %s1257_s29 = smov (!%p259_p9, %s862_s29), 127  ;;  %284 = sbr.rel (%p864_p11) target bundleno = 36 (0x24), region = 55 }
  0x1d   : > { %s863_s4 = sshll.u32 %s1257_s29, 2 }
  0x1e   : > { %s1169_s7 = scalar_lea.vmem %s1247_s1, %s863_s4 }
  0x21   : > { %v1096_v6 = vmov 0.0  }
  0x22   : > { %285 = vst [vmem:[#allocation2 + $0x10] sm:$0xff] %v1096_v6  ;;  %286 = vst [vmem:[#allocation2] sm:$0xff] %v1096_v6 }
  0x23   : > { %287 = vst [vmem:[#allocation2 + $0x8] sm:$0xff] %v1096_v6 }
  0x24 PF: > { %292 = sbr.rel (!%p281_p10) target bundleno = 41 (0x29), region = 59  ;;  %v1097_v7 = vmov (%p281_p10), 0.0  }
  0x25   : > { %293 = vst [vmem:[%s1249_s3] sm:$0x3] (%p281_p10), %v1097_v7 }
  0x29 PF: > { %v1014_v8 = vld [vmem:[%s1169_s7 + $0x78] sm:$0xff]   ;;  %v1018_v12 = vld [vmem:[%s1169_s7 + $0x70] sm:$0xff]   ;;  %v1022_v16 = vld [vmem:[%s1169_s7 + $0x68] sm:$0xff]   ;;  %p906_p12 = scmp.ne.s32.totalorder %s1086_s14, 1 }
  0x2a   : > { %v1015_v9 = vld [vmem:[%s1169_s7 + $0xf8] sm:$0xff]   ;;  %914 = vmatprep.subr.bf16.mxu0 %v1014_v8  ;;  %v1019_v13 = vld [vmem:[%s1169_s7 + $0xf0] sm:$0xff]   ;;  %v1023_v17 = vld [vmem:[%s1169_s7 + $0xe8] sm:$0xff]  }
  0x2b   : > { %v1016_v10 = vld [vmem:[%s1169_s7 + $0x38] sm:$0xff]   ;;  %942 = vmatprep.subr.bf16.mxu1 %v1015_v9  ;;  %v1020_v14 = vld [vmem:[%s1169_s7 + $0x30] sm:$0xff]   ;;  %v1024_v18 = vld [vmem:[%s1169_s7 + $0x28] sm:$0xff]  }
  0x2c   : > { %v1017_v11 = vld [vmem:[%s1169_s7 + $0xb8] sm:$0xff]   ;;  %915 = vmatpush3.bf16.msra.mxu0 %v1016_v10  ;;  %v1021_v15 = vld [vmem:[%s1169_s7 + $0xb0] sm:$0xff]   ;;  %v1025_v19 = vld [vmem:[%s1169_s7 + $0xa8] sm:$0xff]  }
  0x2d   : > { %943 = vmatpush3.bf16.msra.mxu1 %v1017_v11  ;;  %916 = vmatprep.subr.bf16.mxu0 %v1018_v12  ;;  %v1026_v20 = vld [vmem:[%s1169_s7 + $0x60] sm:$0xff]   ;;  %v1030_v24 = vld [vmem:[%s1169_s7 + $0x58] sm:$0xff]   ;;  %v1034_v28 = vld [vmem:[%s1169_s7 + $0x50] sm:$0xff]  }
  0x2e   : > { %944 = vmatprep.subr.bf16.mxu1 %v1019_v13  ;;  %v1027_v21 = vld [vmem:[%s1169_s7 + $0xe0] sm:$0xff]   ;;  %v1031_v25 = vld [vmem:[%s1169_s7 + $0xd8] sm:$0xff]   ;;  %v1035_v29 = vld [vmem:[%s1169_s7 + $0xd0] sm:$0xff]  }
  0x2f   : > { %v1028_v22 = vld [vmem:[%s1169_s7 + $0x20] sm:$0xff]   ;;  %v1032_v26 = vld [vmem:[%s1169_s7 + $0x18] sm:$0xff]   ;;  %v1036_v30 = vld [vmem:[%s1169_s7 + $0x10] sm:$0xff]  }
  0x30   : > { %917 = vmatpush3.bf16.msra.mxu0 %v1020_v14  ;;  %v1029_v23 = vld [vmem:[%s1169_s7 + $0xa0] sm:$0xff]   ;;  %v1033_v27 = vld [vmem:[%s1169_s7 + $0x98] sm:$0xff]   ;;  %v1037_v31 = vld [vmem:[%s1169_s7 + $0x90] sm:$0xff]  }
  0x31   : > { %945 = vmatpush3.bf16.msra.mxu1 %v1021_v15  ;;  %918 = vmatprep.subr.bf16.mxu0 %v1022_v16  ;;  %v1038_v32 = vld [vmem:[%s1169_s7 + $0x48] sm:$0xff]   ;;  %v1042_v36 = vld [vmem:[%s1169_s7 + $0x40] sm:$0xff]   ;;  %v294_v57 = vld [vmem:[#allocation2 + $0x10] sm:$0xff] }
  0x32   : > { %946 = vmatprep.subr.bf16.mxu1 %v1023_v17  ;;  %v1039_v33 = vld [vmem:[%s1169_s7 + $0xc8] sm:$0xff]   ;;  %v1043_v37 = vld [vmem:[%s1169_s7 + $0xc0] sm:$0xff]  }
  0x33   : > { %v1040_v34 = vld [vmem:[%s1169_s7 + $0x8] sm:$0xff]   ;;  %v1044_v38 = vld [vmem:[%s1169_s7] sm:$0xff]  }
  0x34   : > { %919 = vmatpush3.bf16.msra.mxu0 %v1024_v18  ;;  %v1041_v35 = vld [vmem:[%s1169_s7 + $0x88] sm:$0xff]   ;;  %v1045_v39 = vld [vmem:[%s1169_s7 + $0x80] sm:$0xff]  }
  0x35   : > { %947 = vmatpush3.bf16.msra.mxu1 %v1025_v19  ;;  %920 = vmatprep.subr.bf16.mxu0 %v1026_v20  ;;  %v1046_v40 = vld [vmem:[%s1171_s8] ss:$16 sps:$4 sm:$0xff]   ;;  %v1048_v41 = vld [vmem:[%s1171_s8 + $0x4] ss:$16 sps:$4 sm:$0xff]   ;;  %v1049_v42 = vld [vmem:[%s1171_s8 + $0x8] ss:$16 sps:$4 sm:$0xff]  }
  0x36   : > { %948 = vmatprep.subr.bf16.mxu1 %v1027_v21  ;;  %v1051_v43 = vld [vmem:[%s1171_s8 + $0xc] ss:$16 sps:$4 sm:$0xff]   ;;  %v301_v44 = vld [vmem:[%s1171_s8 + $0x20] sm:$0xff]  ;;  %625 = vmatprep.mubr.bf16.mxu0 %v1048_v41 }
  0x37   : > { %v871_v45 = vcombine.high %v301_v44, %v301_v44  ;;  %v302_v46 = vld [vmem:[%s1171_s8 + $0x28] sm:$0xff]  ;;  %673 = vmatprep.mubr.bf16.mxu1 %v1051_v43  ;;  %v870_v48 = vcombine.low %v301_v44, %v301_v44  ;;  %v296_v11 = vld [vmem:[#allocation2 + $0x8] sm:$0xff] }
  0x38   : > { %921 = vmatpush3.bf16.msra.mxu0 %v1028_v22  ;;  %v873_v47 = vcombine.high %v302_v46, %v302_v46  ;;  %v872_v49 = vcombine.low %v302_v46, %v302_v46  ;;  %v295_v2 = vld [vmem:[#allocation2] sm:$0xff] }
  0x39   : > { %949 = vmatpush3.bf16.msra.mxu1 %v1029_v23  ;;  %922 = vmatprep.subr.bf16.mxu0 %v1030_v24 }
  0x3a   : > { %950 = vmatprep.subr.bf16.mxu1 %v1031_v25 }
  0x3c   : > { %923 = vmatpush3.bf16.msra.mxu0 %v1032_v26 }
  0x3d   : > { %951 = vmatpush3.bf16.msra.mxu1 %v1033_v27  ;;  %924 = vmatprep.subr.bf16.mxu0 %v1034_v28 }
  0x3e   : > { %952 = vmatprep.subr.bf16.mxu1 %v1035_v29 }
  0x40   : > { %925 = vmatpush3.bf16.msra.mxu0 %v1036_v30 }
  0x41   : > { %953 = vmatpush3.bf16.msra.mxu1 %v1037_v31  ;;  %926 = vmatprep.subr.bf16.mxu0 %v1038_v32 }
  0x42   : > { %954 = vmatprep.subr.bf16.mxu1 %v1039_v33 }
  0x44   : > { %927 = vmatpush3.bf16.msra.mxu0 %v1040_v34 }
  0x45   : > { %955 = vmatpush3.bf16.msra.mxu1 %v1041_v35  ;;  %928 = vmatprep.subr.bf16.mxu0 %v1042_v36 }
  0x46   : > { %956 = vmatprep.subr.bf16.mxu1 %v1043_v37 }
  0x48   : > { %929 = vmatpush3.bf16.msra.mxu0 %v1044_v38 }
  0x49   : > { %957 = vmatpush3.bf16.msra.mxu1 %v1045_v39 }
  0x4b   : > { %626 = vmatmul.mubr.bf16.vlgmr.msra.gmra.mxu0 %v1046_v40 }
  0x4c   : > { %674 = vmatmul.mubr.bf16.vlgmr.msra.gmra.mxu1 %v1049_v42  ;;  %633 = vmatprep.mubr.bf16.mxu0 %v871_v45 }
  0x4d   : > { %681 = vmatprep.mubr.bf16.mxu1 %v873_v47 }
  0x53   : > { %634 = vmatmul.mubr.bf16.gmra.mxu0 %v870_v48 }
  0x54   : > { %682 = vmatmul.mubr.bf16.gmra.mxu1 %v872_v49 }
 0x10b   : > { %v930_v50 = vpop.f32.mrf.mxu0 }
 0x10c   : > { %v958_v51 = vpop.f32.mrf.mxu1 }
 0x10d   : > { %v931_v52 = vpop.f32.mrf.mxu0 }
 0x10e   : > { %v932_v53 = vadd.f32 %v931_v52, %v930_v50  ;;  %v959_v54 = vpop.f32.mrf.mxu1 }
 0x10f   : > { %v960_v55 = vadd.f32 %v959_v54, %v958_v51  ;;  %v933_v56 = vpop.f32.mrf.mxu0 }
 0x110   : > { %v961_v58 = vpop.f32.mrf.mxu1 }
 0x111   : > { %v676_v59 = vadd.f32 %v960_v55, %v932_v53  ;;  %v934_v60 = vpop.f32.mrf.mxu0 }
 0x112   : > { %v935_v61 = vadd.f32 %v934_v60, %v933_v56  ;;  %v962_v62 = vpop.f32.mrf.mxu1 }
 0x113   : > { %v689_v63 = vadd.f32 %v676_v59, %v294_v57  ;;  %v963_v0 = vadd.f32 %v962_v62, %v961_v58  ;;  %v936_v1 = vpop.f32.mrf.mxu0 }
 0x114   : > { %v964_v3 = vpop.f32.mrf.mxu1 }
 0x115   : > { %692 = vst [vmem:[#allocation2 + $0x10] sm:$0xff] %v689_v63  ;;  %v679_v4 = vadd.f32 %v963_v0, %v935_v61  ;;  %v937_v5 = vpop.f32.mrf.mxu0 }
 0x116   : > { %v938_v6 = vadd.f32 %v937_v5, %v936_v1  ;;  %v965_v7 = vpop.f32.mrf.mxu1 }
 0x117   : > { %v690_v8 = vadd.f32 %v679_v4, %v295_v2  ;;  %v966_v9 = vadd.f32 %v965_v7, %v964_v3  ;;  %v939_v10 = vpop.f32.mrf.mxu0 }
 0x118   : > { %v967_v12 = vpop.f32.mrf.mxu1 }
 0x119   : > { %693 = vst [vmem:[#allocation2] sm:$0xff] %v690_v8  ;;  %v684_v13 = vadd.f32 %v966_v9, %v938_v6  ;;  %v940_v14 = vpop.f32.mrf.mxu0  ;;  %698 = sbr.rel (%p906_p12) target bundleno = 313 (0x139), region = 63 }
 0x11a   : > { %v968_v15 = vpop.f32.mrf.mxu1 }
 0x11b   : > { %v691_v16 = vadd.f32 %v684_v13, %v296_v11 }
 0x11d   : > { %694 = vst [vmem:[#allocation2 + $0x8] sm:$0xff] %v691_v16 }
 0x11e   : > { %v699_v17 = vld [vmem:[#allocation2 + $0x10] sm:$0xff]  ;;  %vm725_vm0 = vcmask 1040384   ;;  %v705_v38 = vld [vmem:[%s1249_s3] sm:$0x3] }
 0x11f   : > { %702 = vst [vmem:[%s1248_s2] sm:$0xff] %v699_v17  ;;  %v714_v20 = vmul.f32 %v699_v17, %v699_v17 }
 0x120   : > { %v700_v18 = vld [vmem:[#allocation2] sm:$0xff] }
 0x121   : > { %703 = vst [vmem:[%s1248_s2 + $0x8] sm:$0xff] %v700_v18  ;;  %v706_v21 = vadd.f32 %v700_v18, %v699_v17  ;;  %v715_v22 = vmul.f32 %v700_v18, %v700_v18 }
 0x123   : > { %v717_v24 = vadd.f32 %v715_v22, %v714_v20 }
 0x124   : > { %v701_v19 = vld [vmem:[#allocation2 + $0x8] sm:$0xff] }
 0x125   : > { %704 = vst [vmem:[%s1248_s2 + $0x10] sm:$0xff] %v701_v19  ;;  %v716_v23 = vmul.f32 %v701_v19, %v701_v19  ;;  %v707_v25 = vadd.f32 %v706_v21, %v701_v19 }
 0x127   : > { %v708_v26 = vrot.slane %v707_v25, 4  ;;  %v718_v27 = vadd.f32 %v717_v24, %v716_v23 }
 0x129   : > { %v709_v28 = vadd.f32 %v708_v26, %v707_v25  ;;  %v719_v29 = vrot.slane %v718_v27, 4 }
 0x12b   : > { %v710_v30 = vrot.slane %v709_v28, 2  ;;  %v720_v31 = vadd.f32 %v719_v29, %v718_v27 }
 0x12d   : > { %v711_v32 = vadd.f32 %v710_v30, %v709_v28  ;;  %v721_v33 = vrot.slane %v720_v31, 2 }
 0x12f   : > { %v712_v34 = vrot.slane %v711_v32, 1  ;;  %v722_v35 = vadd.f32 %v721_v33, %v720_v31 }
 0x131   : > { %v713_v36 = vadd.f32 %v712_v34, %v711_v32  ;;  %v723_v37 = vrot.slane %v722_v35, 1 }
 0x133   : > { %v724_v39 = vadd.f32 %v723_v37, %v722_v35 }
 0x135   : > { %v726_v40 = vsel %vm725_vm0, %v713_v36, %v724_v39 }
 0x136   : > { %v727_v41 = vadd.f32 %v726_v40, %v705_v38 }
 0x138   : > { %728 = vst [vmem:[%s1249_s3] sm:$0x3] %v727_v41 }
 0x139 PF: > { %s14_s16 = sadd.s32 1, %s1094_s16   ;;  %s1250_s12 = smov %s1082_s13 }
 0x13a   : > { %p11_p13 = scmp.ge.s32.totalorder %s14_s16, 4   ;;  %s1251_s13 = smov %s1153_s20 }
 0x13b   : > { %s1252_s14 = smov %s1090_s15  ;;  %s1253_s15 = smov %s1255_s17 }
 0x13c   :  { %13 = sbr.rel (!%p11_p13) target bundleno = 3 (0x3), region = 113 }

// kernel: _lambda_.15
= control target key start
LH: loop header
LB: loop body
LE: loop exit
PB: predicated region body
PF: predicated region fallthrough
CT: control target
= control target key end

     0   :  { %s940_s12 = smov 0   ;;  %s942_s13 = smov 0   ;;  %s1023_s0 = inlined_call_operand.vmem [shape: bf16[8,2048], index: 0, kind: input, shape index: {}]   ;;  %s1024_s1 = inlined_call_operand.vmem [shape: bf16[2048,128], index: 1, kind: input, shape index: {}]   ;;  %s1025_s2 = inlined_call_operand.vmem [shape: f32[1,128], index: 2, kind: input, shape index: {}]   ;;  %s1026_s3 = inlined_call_operand.vmem [shape: f32[8,128], index: 3, kind: output, shape index: {}]  }
   0x1   :  { %s944_s14 = smov 0  }
   0x2 LB: > { %s25_s15 = sadd.s32 1, %s913_s13  ;;  %p743_p0 = scmp.ge.s32.totalorder %s917_s14, 1  ;;  %s917_s14 = sphi %s944_s14, %s13_s14   ;;  %s913_s13 = sphi %s942_s13, %s1028_s13   ;;  %s909_s12 = sphi %s940_s12, %s1027_s12  }
   0x3   : > { %p26_p1 = scmp.ge.s32.totalorder %s25_s15, 4  ;;  %p189_p2 = scmp.lt.s32.totalorder %s917_s14, 5 }
   0x5   : > { %s1030_s15 = smov (%p26_p1, %s25_s15), 0  ;;  %p190_p3 = pnand %p743_p0, %p189_p2 }
   0x6   : > { %s744_s16 = sshll.u32 (!%p190_p3), %s909_s12, 2  ;;  %s746_s17 = sshll.u32 (!%p190_p3), %s909_s12, 6 }
   0x7   : > { %193 = sbr.rel (%p190_p3) target bundleno = 269 (0x10d), region = 32  ;;  %p233_p4 = scmp.lt.s32.totalorder (!%p190_p3), %s744_s16, 15 }
   0x8   : > { %p241_p5 = scmp.lt.s32.totalorder (!%p190_p3), %s746_s17, 255  ;;  %p748_p6 = scmp.ne.s32.totalorder (!%p190_p3), %s909_s12, 0 }
   0xc   : > { %s1032_s16 = smov (!%p233_p4, %s744_s16), 15  ;;  %s1034_s17 = smov (!%p241_p5, %s746_s17), 255 }
   0xd   : > { %s745_s18 = sshll.u32 %s1032_s16, 2  ;;  %s747_s22 = sshll.u32 %s1034_s17, 2 }
   0xe   : > { %s965_s21 = scalar_lea.vmem %s1023_s0, %s745_s18  ;;  %s970_s25 = scalar_lea.vmem %s1024_s1, %s747_s22 }
   0xf   : > { %263 = sbr.rel (%p748_p6) target bundleno = 22 (0x16), region = 36 }
  0x14   : > { %v919_v0 = vmov 0.0  }
  0x15   : > { %264 = vst [vmem:[#allocation2] sm:$0xff] %v919_v0 }
  0x16 PF: > { %v859_v1 = vld [vmem:[%s970_s25 + $0x78] sm:$0xff]   ;;  %v863_v5 = vld [vmem:[%s970_s25 + $0x70] sm:$0xff]   ;;  %v867_v9 = vld [vmem:[%s970_s25 + $0x68] sm:$0xff]   ;;  %p785_p7 = scmp.ne.s32.totalorder %s909_s12, 3 }
  0x17   : > { %v860_v2 = vld [vmem:[%s970_s25 + $0xf8] sm:$0xff]   ;;  %790 = vmatprep.subr.bf16.mxu0 %v859_v1  ;;  %v864_v6 = vld [vmem:[%s970_s25 + $0xf0] sm:$0xff]   ;;  %v868_v10 = vld [vmem:[%s970_s25 + $0xe8] sm:$0xff]  }
  0x18   : > { %v861_v3 = vld [vmem:[%s970_s25 + $0x38] sm:$0xff]   ;;  %812 = vmatprep.subr.bf16.mxu1 %v860_v2  ;;  %v865_v7 = vld [vmem:[%s970_s25 + $0x30] sm:$0xff]   ;;  %v869_v11 = vld [vmem:[%s970_s25 + $0x28] sm:$0xff]  }
  0x19   : > { %v862_v4 = vld [vmem:[%s970_s25 + $0xb8] sm:$0xff]   ;;  %791 = vmatpush3.bf16.msra.mxu0 %v861_v3  ;;  %v866_v8 = vld [vmem:[%s970_s25 + $0xb0] sm:$0xff]   ;;  %v870_v12 = vld [vmem:[%s970_s25 + $0xa8] sm:$0xff]  }
  0x1a   : > { %813 = vmatpush3.bf16.msra.mxu1 %v862_v4  ;;  %792 = vmatprep.subr.bf16.mxu0 %v863_v5  ;;  %v871_v13 = vld [vmem:[%s970_s25 + $0x60] sm:$0xff]   ;;  %v875_v17 = vld [vmem:[%s970_s25 + $0x58] sm:$0xff]   ;;  %v879_v21 = vld [vmem:[%s970_s25 + $0x50] sm:$0xff]  }
  0x1b   : > { %814 = vmatprep.subr.bf16.mxu1 %v864_v6  ;;  %v872_v14 = vld [vmem:[%s970_s25 + $0xe0] sm:$0xff]   ;;  %v876_v18 = vld [vmem:[%s970_s25 + $0xd8] sm:$0xff]   ;;  %v880_v22 = vld [vmem:[%s970_s25 + $0xd0] sm:$0xff]  }
  0x1c   : > { %v873_v15 = vld [vmem:[%s970_s25 + $0x20] sm:$0xff]   ;;  %v877_v19 = vld [vmem:[%s970_s25 + $0x18] sm:$0xff]   ;;  %v881_v23 = vld [vmem:[%s970_s25 + $0x10] sm:$0xff]  }
  0x1d   : > { %793 = vmatpush3.bf16.msra.mxu0 %v865_v7  ;;  %v874_v16 = vld [vmem:[%s970_s25 + $0xa0] sm:$0xff]   ;;  %v878_v20 = vld [vmem:[%s970_s25 + $0x98] sm:$0xff]   ;;  %v882_v24 = vld [vmem:[%s970_s25 + $0x90] sm:$0xff]  }
  0x1e   : > { %815 = vmatpush3.bf16.msra.mxu1 %v866_v8  ;;  %794 = vmatprep.subr.bf16.mxu0 %v867_v9  ;;  %v883_v25 = vld [vmem:[%s970_s25 + $0x48] sm:$0xff]   ;;  %v887_v29 = vld [vmem:[%s970_s25 + $0x40] sm:$0xff]  }
  0x1f   : > { %816 = vmatprep.subr.bf16.mxu1 %v868_v10  ;;  %v884_v26 = vld [vmem:[%s970_s25 + $0xc8] sm:$0xff]   ;;  %v888_v30 = vld [vmem:[%s970_s25 + $0xc0] sm:$0xff]  }
  0x20   : > { %v885_v27 = vld [vmem:[%s970_s25 + $0x8] sm:$0xff]   ;;  %v889_v31 = vld [vmem:[%s970_s25] sm:$0xff]  }
  0x21   : > { %795 = vmatpush3.bf16.msra.mxu0 %v869_v11  ;;  %v886_v28 = vld [vmem:[%s970_s25 + $0x88] sm:$0xff]   ;;  %v890_v32 = vld [vmem:[%s970_s25 + $0x80] sm:$0xff]  }
  0x22   : > { %817 = vmatpush3.bf16.msra.mxu1 %v870_v12  ;;  %796 = vmatprep.subr.bf16.mxu0 %v871_v13  ;;  %v266_v33 = vld [vmem:[%s965_s21] sm:$0xff]  ;;  %v267_v34 = vld [vmem:[%s965_s21 + $0x8] sm:$0xff] }
  0x23   : > { %818 = vmatprep.subr.bf16.mxu1 %v872_v14  ;;  %v749_v35 = vcombine.low %v266_v33, %v266_v33  ;;  %v750_v36 = vcombine.high %v266_v33, %v266_v33  ;;  %v751_v37 = vcombine.low %v267_v34, %v267_v34  ;;  %v752_v38 = vcombine.high %v267_v34, %v267_v34  ;;  %v265_v45 = vld [vmem:[#allocation2] sm:$0xff] }
  0x25   : > { %797 = vmatpush3.bf16.msra.mxu0 %v873_v15  ;;  %570 = vmatprep.mubr.bf16.mxu0 %v750_v36 }
  0x26   : > { %819 = vmatpush3.bf16.msra.mxu1 %v874_v16  ;;  %798 = vmatprep.subr.bf16.mxu0 %v875_v17 }
  0x27   : > { %820 = vmatprep.subr.bf16.mxu1 %v876_v18  ;;  %610 = vmatprep.mubr.bf16.mxu1 %v752_v38 }
  0x29   : > { %799 = vmatpush3.bf16.msra.mxu0 %v877_v19 }
  0x2a   : > { %821 = vmatpush3.bf16.msra.mxu1 %v878_v20  ;;  %800 = vmatprep.subr.bf16.mxu0 %v879_v21 }
  0x2b   : > { %822 = vmatprep.subr.bf16.mxu1 %v880_v22 }
  0x2d   : > { %801 = vmatpush3.bf16.msra.mxu0 %v881_v23 }
  0x2e   : > { %823 = vmatpush3.bf16.msra.mxu1 %v882_v24  ;;  %802 = vmatprep.subr.bf16.mxu0 %v883_v25 }
  0x2f   : > { %824 = vmatprep.subr.bf16.mxu1 %v884_v26 }
  0x31   : > { %803 = vmatpush3.bf16.msra.mxu0 %v885_v27 }
  0x32   : > { %825 = vmatpush3.bf16.msra.mxu1 %v886_v28  ;;  %804 = vmatprep.subr.bf16.mxu0 %v887_v29 }
  0x33   : > { %826 = vmatprep.subr.bf16.mxu1 %v888_v30 }
  0x35   : > { %805 = vmatpush3.bf16.msra.mxu0 %v889_v31 }
  0x36   : > { %827 = vmatpush3.bf16.msra.mxu1 %v890_v32 }
  0x38   : > { %571 = vmatmul.mubr.bf16.vlgmr.msra.gmra.mxu0 %v749_v35 }
  0x39   : > { %611 = vmatmul.mubr.bf16.vlgmr.msra.gmra.mxu1 %v751_v37 }
  0xf8   : > { %v806_v39 = vpop.f32.mrf.mxu0 }
  0xf9   : > { %v828_v40 = vpop.f32.mrf.mxu1 }
  0xfa   : > { %v807_v41 = vpop.f32.mrf.mxu0 }
  0xfb   : > { %v829_v42 = vpop.f32.mrf.mxu1  ;;  %v808_v43 = vadd.f32 %v807_v41, %v806_v39 }
  0xfc   : > { %v830_v44 = vadd.f32 %v829_v42, %v828_v40  ;;  %v809_v46 = vpop.f32.mrf.mxu0 }
  0xfd   : > { %v831_v47 = vpop.f32.mrf.mxu1 }
  0xfe   : > { %v613_v48 = vadd.f32 %v830_v44, %v808_v43  ;;  %v810_v49 = vpop.f32.mrf.mxu0  ;;  %623 = sbr.rel (%p785_p7) target bundleno = 269 (0x10d), region = 40 }
  0xff   : > { %v832_v50 = vpop.f32.mrf.mxu1 }
 0x100   : > { %v618_v51 = vadd.f32 %v613_v48, %v265_v45 }
 0x102   : > { %619 = vst [vmem:[#allocation2] sm:$0xff] %v618_v51 }
 0x103   : > { %v786_v53 = vld [vmem:[%s1025_s2] ss:$0 sm:$0xff] }
 0x109   : > { %v624_v52 = vld [vmem:[#allocation2] sm:$0xff] }
 0x10a   : > { %v632_v54 = vadd.f32 %v786_v53, %v624_v52 }
 0x10c   : > { %633 = vst [vmem:[%s1026_s3] sm:$0xff] %v632_v54 }
 0x10d PF: > { %s13_s14 = sadd.s32 1, %s917_s14   ;;  %s1027_s12 = smov %s913_s13 }
 0x10e   : > { %p10_p8 = scmp.ge.s32.totalorder %s13_s14, 6   ;;  %s1028_s13 = smov %s1030_s15 }
 0x110   :  { %12 = sbr.rel (!%p10_p8) target bundleno = 2 (0x2), region = 76 }

</bundles_post_ra>
